<compile_context>
chip_gen: v6e
topology: v6e:2x2x1
jax: 0.10.0
libtpu: 0.0.40
codegen_flags: <defaults>
</compile_context>

<pallas_src>
import jax
import jax.numpy as jnp
from jax.experimental import pallas as pl
from jax.experimental.pallas import tpu as pltpu

IN_FEATS = 28 * 28          # 784 (kept unpadded; block dim == full array dim)
HIDDEN = 512
OUT_FEATS = 10
OUT_PAD = 128               # lane-dense output slab
V_THRESHOLD = 1.0


def snn_kernel(x_ref, w1_ref, w2_ref, out_ref):
    # x_ref:(tb,784) f32   w1_ref:(784,512) bf16   w2_ref:(512,128) bf16   out_ref:(tb,128) bf16
    # Cast the activations to bf16 in-kernel (VPU work, hidden under the MXU).
    x_bf = x_ref[...].astype(jnp.bfloat16)
    # Linear(784->512), bias=False
    v1 = jnp.dot(x_bf, w1_ref[...], preferred_element_type=jnp.float32)
    # IQIFNode(v_threshold=1.0): single-step heaviside spike from v=0
    s1 = (v1 >= V_THRESHOLD).astype(jnp.bfloat16)
    # Linear(512->10), bias=False (zero-padded output columns give v2=0 -> spike 0)
    v2 = jnp.dot(s1, w2_ref[...], preferred_element_type=jnp.float32)
    # IQIFNode(v_threshold=1.0)
    out_ref[...] = (v2 >= V_THRESHOLD).astype(out_ref.dtype)


def _round_up(n, m):
    return ((n + m - 1) // m) * m


def _choose_tb(n):
    """Batch-tile heuristic (see header comments)."""
    if n >= 2048:
        return 1024                       # big tiles amortize per-step overhead
    if n >= 256:
        return _round_up(n, 16) // 2      # 2 even tiles -> both v7x TCs busy
    return _round_up(max(n, 8), 8)        # tiny batch: one step (best on 1-TC chips)


def _prepare_weights(w1, w2):
    w1t = jnp.transpose(w1).astype(jnp.bfloat16)                     # (784, 512)
    w2t = jnp.pad(jnp.transpose(w2).astype(jnp.bfloat16),
                  ((0, 0), (0, OUT_PAD - OUT_FEATS)))                # (512, 128)
    return w1t, w2t


def snn_forward(x_nchw, w1, w2, *, tb=None):
    """x_nchw: (N,1,28,28) f32; w1: (512,784); w2: (10,512). Returns (N,10) f32 spikes."""
    N = x_nchw.shape[0]
    if tb is None:
        tb = _choose_tb(N)
    tb = _round_up(max(8, min(tb, _round_up(N, 8))), 8)
    Np = _round_up(N, tb)

    x2 = x_nchw.reshape(N, IN_FEATS)                 # free reshape, stays f32
    if Np != N:
        x2 = jnp.pad(x2, ((0, Np - N), (0, 0)))      # padded rows -> spikes 0, sliced off
    w1t, w2t = _prepare_weights(w1, w2)

    # VMEM budget: double-buffered f32 x tile, resident bf16 weights,
    # double-buffered bf16 output tile, plus margin for in-kernel temporaries.
    vmem_bytes = (2 * tb * IN_FEATS * 4
                  + IN_FEATS * HIDDEN * 2
                  + HIDDEN * OUT_PAD * 2
                  + 2 * tb * OUT_PAD * 2
                  + tb * HIDDEN * 6)                 # v1 f32 + s1 bf16 temporaries
    vmem_limit = min(max(vmem_bytes + (8 << 20), 16 << 20), 48 << 20)

    grid = (Np // tb,)
    out_padded = pl.pallas_call(
        snn_kernel,
        out_shape=jax.ShapeDtypeStruct((Np, OUT_PAD), jnp.bfloat16),
        grid_spec=pltpu.PrefetchScalarGridSpec(
            num_scalar_prefetch=0,
            grid=grid,
            in_specs=[
                pl.BlockSpec((tb, IN_FEATS), lambda i: (i, 0)),      # f32 x tile
                pl.BlockSpec((IN_FEATS, HIDDEN), lambda i: (0, 0)),  # VMEM-resident w1
                pl.BlockSpec((HIDDEN, OUT_PAD), lambda i: (0, 0)),   # VMEM-resident w2
            ],
            out_specs=pl.BlockSpec((tb, OUT_PAD), lambda i: (i, 0)),
        ),
        compiler_params=pltpu.CompilerParams(
            dimension_semantics=("parallel",),
            vmem_limit_bytes=vmem_limit,
        ),
    )(x2, w1t, w2t)
    return out_padded[:N, :OUT_FEATS].astype(jnp.float32)


def reference_forward(x_nchw, w1, w2):
    """Pure-JAX reference using the identical bf16-operand / f32-accumulate path."""
    N = x_nchw.shape[0]
    x2 = x_nchw.reshape(N, IN_FEATS).astype(jnp.bfloat16)
    w1t, w2t = _prepare_weights(w1, w2)
    v1 = jnp.dot(x2, w1t, preferred_element_type=jnp.float32)
    s1 = (v1 >= V_THRESHOLD).astype(jnp.bfloat16)
    v2 = jnp.dot(s1, w2t, preferred_element_type=jnp.float32)
    spk = (v2 >= V_THRESHOLD).astype(jnp.float32)
    return spk[:, :OUT_FEATS]


if __name__ == "__main__":
    key = jax.random.PRNGKey(0)
    kx, k1, k2 = jax.random.split(key, 3)

    batch = 256            # MNIST-style batch; auto tb -> 128, grid of 2 even tiles
    x = jax.random.normal(kx, (batch, 1, 28, 28), dtype=jnp.float32)

    # Deterministic init mimicking nn.Linear default: U(-1/sqrt(in), 1/sqrt(in))
    b1 = 1.0 / jnp.sqrt(jnp.float32(IN_FEATS))
    b2 = 1.0 / jnp.sqrt(jnp.float32(HIDDEN))
    w1 = jax.random.uniform(k1, (HIDDEN, IN_FEATS), jnp.float32, -b1, b1)   # (512, 784)
    w2 = jax.random.uniform(k2, (OUT_FEATS, HIDDEN), jnp.float32, -b2, b2)  # (10, 512)

    out = snn_forward(x, w1, w2)
    out = jax.block_until_ready(out)

    ref = reference_forward(x, w1, w2)
    assert out.shape == (batch, OUT_FEATS)
    assert jnp.array_equal(out, ref)

    print("KERNEL_OK")
</pallas_src>

<mosaic_0001>
module attributes {stable_mosaic.version = 11 : i64} {
  func.func @snn_kernel(%arg0: i32, %arg1: memref<128x784xf32, #tpu.memory_space<vmem>>, %arg2: memref<784x512xbf16, #tpu.memory_space<vmem>>, %arg3: memref<512x128xbf16, #tpu.memory_space<vmem>>, %arg4: memref<128x128xbf16, #tpu.memory_space<vmem>>) attributes {dimension_semantics = [#tpu.dimension_semantics<parallel>], iteration_bounds = array<i64: 2>, scalar_prefetch = 0 : i64, scratch_operands = 0 : i64, tpu.core_type = #tpu.core_type<tc>, window_params = [{transform_indices = @transform_0, window_bounds = array<i64: 128, 784>}, {pipeline_mode = #tpu.pipeline_mode<synchronous>, transform_indices = @transform_1, window_bounds = array<i64: 784, 512>}, {pipeline_mode = #tpu.pipeline_mode<synchronous>, transform_indices = @transform_2, window_bounds = array<i64: 512, 128>}, {transform_indices = @transform_3, window_bounds = array<i64: 128, 128>}]} {
    %c0 = arith.constant 0 : index
    %c0_0 = arith.constant 0 : index
    %0 = vector.load %arg1[%c0, %c0_0] : memref<128x784xf32, #tpu.memory_space<vmem>>, vector<128x784xf32>
    %1 = arith.truncf %0 : vector<128x784xf32> to vector<128x784xbf16>
    %c0_1 = arith.constant 0 : index
    %c0_2 = arith.constant 0 : index
    %2 = vector.load %arg2[%c0_1, %c0_2] : memref<784x512xbf16, #tpu.memory_space<vmem>>, vector<784x512xbf16>
    %cst = arith.constant dense<0.000000e+00> : vector<128x512xf32>
    %3 = tpu.matmul %1, %2, %cst {dimension_numbers = #tpu.dot_dimension_numbers<[1], [0], [0], [1], [0, 0, 1, 1], [], []>} : vector<128x784xbf16>, vector<784x512xbf16>, vector<128x512xf32> -> vector<128x512xf32>
    %cst_3 = arith.constant 1.000000e+00 : f32
    %4 = vector.broadcast %cst_3 : f32 to vector<128x512xf32>
    %5 = arith.cmpf oge, %3, %4 : vector<128x512xf32>
    %6 = arith.extui %5 : vector<128x512xi1> to vector<128x512xi32>
    %7 = arith.sitofp %6 : vector<128x512xi32> to vector<128x512xf32>
    %8 = arith.truncf %7 : vector<128x512xf32> to vector<128x512xbf16>
    %c0_4 = arith.constant 0 : index
    %c0_5 = arith.constant 0 : index
    %9 = vector.load %arg3[%c0_4, %c0_5] : memref<512x128xbf16, #tpu.memory_space<vmem>>, vector<512x128xbf16>
    %cst_6 = arith.constant dense<0.000000e+00> : vector<128x128xf32>
    %10 = tpu.matmul %8, %9, %cst_6 {dimension_numbers = #tpu.dot_dimension_numbers<[1], [0], [0], [1], [0, 0, 1, 1], [], []>} : vector<128x512xbf16>, vector<512x128xbf16>, vector<128x128xf32> -> vector<128x128xf32>
    %cst_7 = arith.constant 1.000000e+00 : f32
    %11 = vector.broadcast %cst_7 : f32 to vector<128x128xf32>
    %12 = arith.cmpf oge, %10, %11 : vector<128x128xf32>
    %13 = arith.extui %12 : vector<128x128xi1> to vector<128x128xi32>
    %14 = arith.sitofp %13 : vector<128x128xi32> to vector<128x128xf32>
    %15 = arith.truncf %14 : vector<128x128xf32> to vector<128x128xbf16>
    %c0_8 = arith.constant 0 : index
    %c0_9 = arith.constant 0 : index
    %16 = vector.load %arg4[%c0_8, %c0_9] : memref<128x128xbf16, #tpu.memory_space<vmem>>, vector<128x128xbf16>
    tpu.vector_store %arg4[%c0_8, %c0_9], %15 {strides = array<i32>} : memref<128x128xbf16, #tpu.memory_space<vmem>>, vector<128x128xbf16>,
    return
  }
  func.func @transform_0(%arg0: i32) -> (i32, i32) {
    %c0_i32 = arith.constant 0 : i32
    %c0_i32_0 = arith.constant 0 : i32
    return %arg0, %c0_i32 : i32, i32
  }
  func.func @transform_1(%arg0: i32) -> (i32, i32) {
    %c0_i32 = arith.constant 0 : i32
    %c0_i32_0 = arith.constant 0 : i32
    %c0_i32_1 = arith.constant 0 : i32
    return %c0_i32, %c0_i32_0 : i32, i32
  }
  func.func @transform_2(%arg0: i32) -> (i32, i32) {
    %c0_i32 = arith.constant 0 : i32
    %c0_i32_0 = arith.constant 0 : i32
    %c0_i32_1 = arith.constant 0 : i32
    return %c0_i32, %c0_i32_0 : i32, i32
  }
  func.func @transform_3(%arg0: i32) -> (i32, i32) {
    %c0_i32 = arith.constant 0 : i32
    %c0_i32_0 = arith.constant 0 : i32
    return %arg0, %c0_i32 : i32, i32
  }
}

</mosaic_0001>

<bundles_post_ra>
// kernel: tpu_custom_call.1
= control target key start
LH: loop header
LB: loop body
LE: loop exit
PB: predicated region body
PF: predicated region fallthrough
CT: control target
= control target key end

     0   :  { %8 = vsyncpa [#allocation3], 0  ;;  %s5980_s0 = inlined_call_operand.vmem [shape: f32[256,784], index: 0, kind: input, shape index: {}]   ;;  %s5981_s1 = inlined_call_operand.vmem [shape: bf16[784,512], index: 1, kind: input, shape index: {}]   ;;  %s5982_s2 = inlined_call_operand.vmem [shape: bf16[512,128], index: 2, kind: input, shape index: {}]   ;;  %s5983_s3 = inlined_call_operand.hbm [shape: bf16[256,128], index: 3, kind: output, shape index: {}]  }
   0x1   :  { %10 = vsyncpa [#allocation3 + $0x1], 0  ;;  %s4378_s12 = smov 0   ;;  %s4380_s13 = smov 0  }
   0x2   :  { %s4382_s14 = smov 0   ;;  %s4384_s15 = smov 0  }
   0x3 LB: > { %s4399_s16 = sadd.s32 4294967295, %s4350_s15   ;;  %s3327_s17 = sadd.s32 4294967294, %s4350_s15   ;;  %s4350_s15 = sphi %s4384_s15, %s6047_s15   ;;  %s4346_s14 = sphi %s4382_s14, %s6046_s14   ;;  %s4342_s13 = sphi %s4380_s13, %s6045_s13   ;;  %s4338_s12 = sphi %s4378_s12, %s6044_s12  }
   0x4   : > { %s4403_s18 = sadd.s32 1, %s4350_s15   ;;  %s91_s19 = sadd.s32 1, %s4346_s14 }
   0x5   : > { %s88_s20 = ssub.s32 %s4350_s15, %s4403_s18  ;;  %p101_p0 = scmp.ne.s32.totalorder %s4346_s14, %s4342_s13 }
   0x6   : > { %p89_p1 = scmp.eq.s32.totalorder %s88_s20, 0  ;;  %p102_p2 = scmp.eq.s32.totalorder %s4399_s16, 1 }
   0x7   : > { %p107_p3 = scmp.ne.s32.totalorder %s4342_s13, %s4338_s12  ;;  %p108_p4 = scmp.eq.s32.totalorder %s3327_s17, 1 }
   0x8   : > { %s4414_s21 = scalar_select %p89_p1, %s4346_s14, %s91_s19  }
   0x9   : > { %p4416_p5 = por %p102_p2, %p101_p0  ;;  %p4420_p6 = por %p108_p4, %p107_p3 }
   0xa   : > { %p3330_p7 = scmp.ge.s32.totalorder %s4350_s15, 1  ;;  %p142_p8 = scmp.lt.s32.totalorder %s4350_s15, 3 }
   0xc   : > { %p143_p9 = pnand %p3330_p7, %p142_p8 }
   0xe   : > { %146 = sbr.rel (%p143_p9) target bundleno = 759 (0x2f7), region = 32 }
  0x13   : > { %v3964_v0 = vld [vmem:[%s5981_s1 + $0xe4] ss:$16 sps:$4 sm:$0xff]   ;;  %v3968_v2 = vld [vmem:[%s5981_s1 + $0xe0] ss:$16 sps:$4 sm:$0xff]   ;;  %s3332_s28 = sshll.u32 %s4399_s16, 4  ;;  %vm1520_vm0 = vcmask 130048  }
  0x14   : > { %v3966_v1 = vld [vmem:[%s5981_s1 + $0x2e4] ss:$16 sps:$4 sm:$0xff]   ;;  %1545 = vmatprep.subr.bf16.mxu0 %v3964_v0  ;;  %v3969_v3 = vld [vmem:[%s5981_s1 + $0x2e0] ss:$16 sps:$4 sm:$0xff]   ;;  %p168_p10 = scmp.lt.s32.totalorder %s3332_s28, 31  ;;  %s3759_s6 = sshll.u32 %s4399_s16, 10 }
  0x15   : > { %1658 = vmatprep.subr.bf16.mxu1 %v3966_v1  ;;  %v3970_v4 = vld [vmem:[%s5981_s1 + $0xc4] ss:$16 sps:$4 sm:$0xff]   ;;  %1546 = vmatpush1.bf16.msra.mxu0 %v3968_v2  ;;  %v3974_v6 = vld [vmem:[%s5981_s1 + $0xc0] ss:$16 sps:$4 sm:$0xff]   ;;  %s5933_s10 = scalar_lea.hbm %s5983_s3, %s3759_s6  ;;  %s4355_s17 = smov [#allocation2]  }
  0x16   : > { %1659 = vmatpush1.bf16.msra.mxu1 %v3969_v3  ;;  %v3972_v5 = vld [vmem:[%s5981_s1 + $0x2c4] ss:$16 sps:$4 sm:$0xff]   ;;  %1547 = vmatprep.subr.bf16.mxu0 %v3970_v4  ;;  %v3975_v7 = vld [vmem:[%s5981_s1 + $0x2c0] ss:$16 sps:$4 sm:$0xff]   ;;  %s6049_s28 = smov (!%p168_p10, %s3332_s28), 31  ;;  %s4294_s19 = sshll.u32 %s4355_s17, 4  ;;  %s4295_s19 = int_to_ptr.vmem [resolvable:$false] %s4294_s19 }
  0x17   : > { %1660 = vmatprep.subr.bf16.mxu1 %v3972_v5  ;;  %v3976_v8 = vld [vmem:[%s5981_s1 + $0xa4] ss:$16 sps:$4 sm:$0xff]   ;;  %v3980_v10 = vld [vmem:[%s5981_s1 + $0xa0] ss:$16 sps:$4 sm:$0xff]   ;;  %s3919_s5 = smul.u32 56, %s6049_s28  ;;  %s4296_s28 = scalar_lea.vmem %s4295_s19, 2048 }
  0x18   : > { %v3978_v9 = vld [vmem:[%s5981_s1 + $0x2a4] ss:$16 sps:$4 sm:$0xff]   ;;  %v3981_v11 = vld [vmem:[%s5981_s1 + $0x2a0] ss:$16 sps:$4 sm:$0xff]  }
  0x19   : > { %1548 = vmatpush1.bf16.msra.mxu0 %v3974_v6  ;;  %v3982_v12 = vld [vmem:[%s5981_s1 + $0x84] ss:$16 sps:$4 sm:$0xff]   ;;  %v3986_v14 = vld [vmem:[%s5981_s1 + $0x80] ss:$16 sps:$4 sm:$0xff]   ;;  %s4562_s26 = scalar_lea.vmem %s5980_s0, %s3919_s5 }
  0x1a   : > { %1661 = vmatpush1.bf16.msra.mxu1 %v3975_v7  ;;  %1549 = vmatprep.subr.bf16.mxu0 %v3976_v8  ;;  %v3984_v13 = vld [vmem:[%s5981_s1 + $0x284] ss:$16 sps:$4 sm:$0xff]   ;;  %v3987_v15 = vld [vmem:[%s5981_s1 + $0x280] ss:$16 sps:$4 sm:$0xff]   ;;  %v177_v46 = vld [vmem:[%s4562_s26 + $0x8] sm:$0xff] }
  0x1b   : > { %1662 = vmatprep.subr.bf16.mxu1 %v3978_v9  ;;  %v3988_v16 = vld [vmem:[%s5981_s1 + $0x64] ss:$16 sps:$4 sm:$0xff]   ;;  %v3992_v18 = vld [vmem:[%s5981_s1 + $0x60] ss:$16 sps:$4 sm:$0xff]   ;;  %v179_v48 = vld [vmem:[%s4562_s26 + $0x18] sm:$0xff] }
  0x1c   : > { %v3990_v17 = vld [vmem:[%s5981_s1 + $0x264] ss:$16 sps:$4 sm:$0xff]   ;;  %v3993_v19 = vld [vmem:[%s5981_s1 + $0x260] ss:$16 sps:$4 sm:$0xff]   ;;  %v183_v7 = vld [vmem:[%s4562_s26 + $0x38] sm:$0xff] }
  0x1d   : > { %1550 = vmatpush1.bf16.msra.mxu0 %v3980_v10  ;;  %v3994_v20 = vld [vmem:[%s5981_s1 + $0x44] ss:$16 sps:$4 sm:$0xff]   ;;  %v3998_v22 = vld [vmem:[%s5981_s1 + $0x40] ss:$16 sps:$4 sm:$0xff]   ;;  %v185_v9 = vld [vmem:[%s4562_s26 + $0x48] sm:$0xff] }
  0x1e   : > { %1663 = vmatpush1.bf16.msra.mxu1 %v3981_v11  ;;  %1551 = vmatprep.subr.bf16.mxu0 %v3982_v12  ;;  %v3996_v21 = vld [vmem:[%s5981_s1 + $0x244] ss:$16 sps:$4 sm:$0xff]   ;;  %v3999_v23 = vld [vmem:[%s5981_s1 + $0x240] ss:$16 sps:$4 sm:$0xff]  }
  0x1f   : > { %1664 = vmatprep.subr.bf16.mxu1 %v3984_v13  ;;  %v4000_v24 = vld [vmem:[%s5981_s1 + $0x24] ss:$16 sps:$4 sm:$0xff]   ;;  %v4004_v26 = vld [vmem:[%s5981_s1 + $0x20] ss:$16 sps:$4 sm:$0xff]   ;;  %v191_v13 = vld [vmem:[%s4562_s26 + $0x78] sm:$0xff] }
  0x20   : > { %v4002_v25 = vld [vmem:[%s5981_s1 + $0x224] ss:$16 sps:$4 sm:$0xff]   ;;  %v4005_v27 = vld [vmem:[%s5981_s1 + $0x220] ss:$16 sps:$4 sm:$0xff]  }
  0x21   : > { %1552 = vmatpush1.bf16.msra.mxu0 %v3986_v14  ;;  %v4006_v28 = vld [vmem:[%s5981_s1 + $0x4] ss:$16 sps:$4 sm:$0xff]   ;;  %v4010_v30 = vld [vmem:[%s5981_s1] ss:$16 sps:$4 sm:$0xff]  }
  0x22   : > { %1665 = vmatpush1.bf16.msra.mxu1 %v3987_v15  ;;  %1553 = vmatprep.subr.bf16.mxu0 %v3988_v16  ;;  %v4008_v29 = vld [vmem:[%s5981_s1 + $0x204] ss:$16 sps:$4 sm:$0xff]   ;;  %v4011_v31 = vld [vmem:[%s5981_s1 + $0x200] ss:$16 sps:$4 sm:$0xff]  }
  0x23   : > { %1666 = vmatprep.subr.bf16.mxu1 %v3990_v17  ;;  %v4012_v32 = vld [vmem:[%s5981_s1 + $0x1e4] ss:$16 sps:$4 sm:$0xff]   ;;  %v4016_v34 = vld [vmem:[%s5981_s1 + $0x1e0] ss:$16 sps:$4 sm:$0xff]   ;;  %v193_v17 = vld [vmem:[%s4562_s26 + $0x88] sm:$0xff] }
  0x24   : > { %v4014_v33 = vld [vmem:[%s5981_s1 + $0x3e4] ss:$16 sps:$4 sm:$0xff]   ;;  %v4017_v35 = vld [vmem:[%s5981_s1 + $0x3e0] ss:$16 sps:$4 sm:$0xff]  }
  0x25   : > { %1554 = vmatpush1.bf16.msra.mxu0 %v3992_v18  ;;  %v4018_v36 = vld [vmem:[%s5981_s1 + $0x1c4] ss:$16 sps:$4 sm:$0xff]   ;;  %v4022_v38 = vld [vmem:[%s5981_s1 + $0x1c0] ss:$16 sps:$4 sm:$0xff]  }
  0x26   : > { %1667 = vmatpush1.bf16.msra.mxu1 %v3993_v19  ;;  %1555 = vmatprep.subr.bf16.mxu0 %v3994_v20  ;;  %v4020_v37 = vld [vmem:[%s5981_s1 + $0x3c4] ss:$16 sps:$4 sm:$0xff]   ;;  %v4023_v39 = vld [vmem:[%s5981_s1 + $0x3c0] ss:$16 sps:$4 sm:$0xff]  }
  0x27   : > { %1668 = vmatprep.subr.bf16.mxu1 %v3996_v21  ;;  %v4024_v40 = vld [vmem:[%s5981_s1 + $0x1a4] ss:$16 sps:$4 sm:$0xff]   ;;  %v4028_v42 = vld [vmem:[%s5981_s1 + $0x1a0] ss:$16 sps:$4 sm:$0xff]  }
  0x28   : > { %v4026_v41 = vld [vmem:[%s5981_s1 + $0x3a4] ss:$16 sps:$4 sm:$0xff]   ;;  %v4029_v43 = vld [vmem:[%s5981_s1 + $0x3a0] ss:$16 sps:$4 sm:$0xff]  }
  0x29   : > { %1556 = vmatpush1.bf16.msra.mxu0 %v3998_v22  ;;  %v4030_v44 = vld [vmem:[%s5981_s1 + $0x184] ss:$16 sps:$4 sm:$0xff]   ;;  %v4034_v50 = vld [vmem:[%s5981_s1 + $0x180] ss:$16 sps:$4 sm:$0xff]  }
  0x2a   : > { %1669 = vmatpush1.bf16.msra.mxu1 %v3999_v23  ;;  %1557 = vmatprep.subr.bf16.mxu0 %v4000_v24  ;;  %v4032_v45 = vld [vmem:[%s5981_s1 + $0x384] ss:$16 sps:$4 sm:$0xff]   ;;  %v4035_v51 = vld [vmem:[%s5981_s1 + $0x380] ss:$16 sps:$4 sm:$0xff]  }
  0x2b   : > { %1670 = vmatprep.subr.bf16.mxu1 %v4002_v25  ;;  %v184_v47 = vld [vmem:[%s4562_s26 + $0x40] sm:$0xff]  ;;  %v186_v49 = vld [vmem:[%s4562_s26 + $0x50] sm:$0xff]  ;;  %v197_v25 = vld [vmem:[%s4562_s26 + $0xa8] sm:$0xff] }
  0x2c   : > { %v4036_v52 = vld [vmem:[%s5981_s1 + $0x164] ss:$16 sps:$4 sm:$0xff]   ;;  %v4583_v53 = vpack.c.bf16 %v184_v47, %v177_v46  ;;  %v4585_v54 = vpack.c.bf16 %v186_v49, %v179_v48  ;;  %v4040_v56 = vld [vmem:[%s5981_s1 + $0x160] ss:$16 sps:$4 sm:$0xff]   ;;  %v221_v47 = vld [vmem:[%s4562_s26 + $0x168] sm:$0xff] }
  0x2d   : > { %1558 = vmatpush1.bf16.msra.mxu0 %v4004_v26  ;;  %v4038_v55 = vld [vmem:[%s5981_s1 + $0x364] ss:$16 sps:$4 sm:$0xff]   ;;  %v4041_v57 = vld [vmem:[%s5981_s1 + $0x360] ss:$16 sps:$4 sm:$0xff]  }
  0x2e   : > { %1671 = vmatpush1.bf16.msra.mxu1 %v4005_v27  ;;  %1559 = vmatprep.subr.bf16.mxu0 %v4006_v28  ;;  %v4042_v58 = vld [vmem:[%s5981_s1 + $0x144] ss:$16 sps:$4 sm:$0xff]   ;;  %v4046_v60 = vld [vmem:[%s5981_s1 + $0x140] ss:$16 sps:$4 sm:$0xff]   ;;  %v199_v27 = vld [vmem:[%s4562_s26 + $0xb8] sm:$0xff] }
  0x2f   : > { %1672 = vmatprep.subr.bf16.mxu1 %v4008_v29  ;;  %1577 = vmatprep.mubr.bf16.mxu0 %v4583_v53  ;;  %v4044_v59 = vld [vmem:[%s5981_s1 + $0x344] ss:$16 sps:$4 sm:$0xff]   ;;  %v4047_v61 = vld [vmem:[%s5981_s1 + $0x340] ss:$16 sps:$4 sm:$0xff]   ;;  %v205_v29 = vld [vmem:[%s4562_s26 + $0xe8] sm:$0xff] }
  0x30   : > { %1690 = vmatprep.mubr.bf16.mxu1 %v4585_v54  ;;  %v4048_v62 = vld [vmem:[%s5981_s1 + $0x124] ss:$16 sps:$4 sm:$0xff]   ;;  %v4052_v0 = vld [vmem:[%s5981_s1 + $0x120] ss:$16 sps:$4 sm:$0xff]  }
  0x31   : > { %1560 = vmatpush1.bf16.msra.mxu0 %v4010_v30  ;;  %v4050_v63 = vld [vmem:[%s5981_s1 + $0x324] ss:$16 sps:$4 sm:$0xff]   ;;  %v4053_v1 = vld [vmem:[%s5981_s1 + $0x320] ss:$16 sps:$4 sm:$0xff]  }
  0x32   : > { %1673 = vmatpush1.bf16.msra.mxu1 %v4011_v31  ;;  %1561 = vmatprep.subr.bf16.mxu0 %v4012_v32  ;;  %v4054_v2 = vld [vmem:[%s5981_s1 + $0x104] ss:$16 sps:$4 sm:$0xff]   ;;  %v4058_v4 = vld [vmem:[%s5981_s1 + $0x100] ss:$16 sps:$4 sm:$0xff]   ;;  %v207_v31 = vld [vmem:[%s4562_s26 + $0xf8] sm:$0xff] }
  0x33   : > { %1674 = vmatprep.subr.bf16.mxu1 %v4014_v33  ;;  %v4056_v3 = vld [vmem:[%s5981_s1 + $0x304] ss:$16 sps:$4 sm:$0xff]   ;;  %v4059_v5 = vld [vmem:[%s5981_s1 + $0x300] ss:$16 sps:$4 sm:$0xff]  }
  0x34   : > { %v176_v6 = vld [vmem:[%s4562_s26] sm:$0xff]  ;;  %v178_v8 = vld [vmem:[%s4562_s26 + $0x10] sm:$0xff] }
  0x35   : > { %1562 = vmatpush2.bf16.msra.mxu0 %v4016_v34  ;;  %v4062_v10 = vld [vmem:[%s5981_s1 + $0x4e4] ss:$16 sps:$4 sm:$0xff]   ;;  %v4060_v12 = vld [vmem:[%s5981_s1 + $0x4e0] ss:$16 sps:$4 sm:$0xff]   ;;  %v4649_v15 = vpack.c.bf16 %v183_v7, %v176_v6  ;;  %v4651_v16 = vpack.c.bf16 %v185_v9, %v178_v8 }
  0x36   : > { %1675 = vmatpush2.bf16.msra.mxu1 %v4017_v35  ;;  %1563 = vmatprep.subr.bf16.mxu0 %v4018_v36  ;;  %v4065_v11 = vld [vmem:[%s5981_s1 + $0x604] ss:$16 sps:$4 sm:$0xff]   ;;  %v4063_v19 = vld [vmem:[%s5981_s1 + $0x600] ss:$16 sps:$4 sm:$0xff]  }
  0x37   : > { %1676 = vmatprep.subr.bf16.mxu1 %v4020_v37  ;;  %v198_v14 = vld [vmem:[%s4562_s26 + $0xb0] sm:$0xff]  ;;  %v200_v18 = vld [vmem:[%s4562_s26 + $0xc0] sm:$0xff] }
  0x38   : > { %v4068_v20 = vld [vmem:[%s5981_s1 + $0x4c4] ss:$16 sps:$4 sm:$0xff]   ;;  %v4661_v21 = vpack.c.bf16 %v198_v14, %v191_v13  ;;  %v4066_v22 = vld [vmem:[%s5981_s1 + $0x4c0] ss:$16 sps:$4 sm:$0xff]   ;;  %v4666_v23 = vpack.c.bf16 %v200_v18, %v193_v17  ;;  %v4116_v13 = vld [vmem:[%s5981_s1 + $0x2ec] ss:$16 sps:$4 sm:$0xff]  }
  0x39   : > { %1564 = vmatpush2.bf16.msra.mxu0 %v4022_v38  ;;  %v190_v24 = vld [vmem:[%s4562_s26 + $0x70] sm:$0xff]  ;;  %v192_v26 = vld [vmem:[%s4562_s26 + $0x80] sm:$0xff]  ;;  %v241_v14 = vld [vmem:[%s4562_s26 + $0x208] sm:$0xff] }
  0x3a   : > { %1677 = vmatpush2.bf16.msra.mxu1 %v4023_v39  ;;  %1565 = vmatprep.subr.bf16.mxu0 %v4024_v40  ;;  %v4071_v28 = vld [vmem:[%s5981_s1 + $0x4a4] ss:$16 sps:$4 sm:$0xff]   ;;  %v4683_v33 = vpack.c.bf16 %v197_v25, %v190_v24  ;;  %v4685_v34 = vpack.c.bf16 %v199_v27, %v192_v26  ;;  %v4069_v35 = vld [vmem:[%s5981_s1 + $0x4a0] ss:$16 sps:$4 sm:$0xff]   ;;  %v247_v18 = vld [vmem:[%s4562_s26 + $0x238] sm:$0xff] }
  0x3b   : > { %1678 = vmatprep.subr.bf16.mxu1 %v4026_v41  ;;  %v212_v30 = vld [vmem:[%s4562_s26 + $0x120] sm:$0xff]  ;;  %v214_v32 = vld [vmem:[%s4562_s26 + $0x130] sm:$0xff]  ;;  %v211_v41 = vld [vmem:[%s4562_s26 + $0x118] sm:$0xff] }
  0x3c   : > { %v4690_v36 = vpack.c.bf16 %v212_v30, %v205_v29  ;;  %v4074_v37 = vld [vmem:[%s5981_s1 + $0x484] ss:$16 sps:$4 sm:$0xff]   ;;  %v4695_v38 = vpack.c.bf16 %v214_v32, %v207_v31  ;;  %v4072_v39 = vld [vmem:[%s5981_s1 + $0x480] ss:$16 sps:$4 sm:$0xff]   ;;  %v253_v32 = vld [vmem:[%s4562_s26 + $0x268] sm:$0xff] }
  0x3d   : > { %1566 = vmatpush2.bf16.msra.mxu0 %v4028_v42  ;;  %v204_v40 = vld [vmem:[%s4562_s26 + $0xe0] sm:$0xff]  ;;  %v206_v42 = vld [vmem:[%s4562_s26 + $0xf0] sm:$0xff] }
  0x3e   : > { %1679 = vmatpush2.bf16.msra.mxu1 %v4029_v43  ;;  %1567 = vmatprep.subr.bf16.mxu0 %v4030_v44  ;;  %v213_v43 = vld [vmem:[%s4562_s26 + $0x128] sm:$0xff]  ;;  %v4077_v44 = vld [vmem:[%s5981_s1 + $0x464] ss:$16 sps:$4 sm:$0xff]   ;;  %v4715_v49 = vpack.c.bf16 %v211_v41, %v204_v40  ;;  %v4084_v9 = vld [vmem:[%s5981_s1 + $0x400] ss:$16 sps:$4 sm:$0xff]  }
  0x3f   : > { %1680 = vmatprep.subr.bf16.mxu1 %v4032_v45  ;;  %v219_v45 = vld [vmem:[%s4562_s26 + $0x158] sm:$0xff]  ;;  %v226_v46 = vld [vmem:[%s4562_s26 + $0x190] sm:$0xff]  ;;  %v228_v48 = vld [vmem:[%s4562_s26 + $0x1a0] sm:$0xff] }
  0x40   : > { %v4086_v7 = vld [vmem:[%s5981_s1 + $0x404] ss:$16 sps:$4 sm:$0xff]   ;;  %v4087_v26 = vld [vmem:[%s5981_s1 + $0x5e0] ss:$16 sps:$4 sm:$0xff]   ;;  %v261_v40 = vld [vmem:[%s4562_s26 + $0x2a8] sm:$0xff] }
  0x41   : > { %1568 = vmatpush2.bf16.msra.mxu0 %v4034_v50  ;;  %v4717_v50 = vpack.c.bf16 %v213_v43, %v206_v42  ;;  %v4089_v17 = vld [vmem:[%s5981_s1 + $0x5e4] ss:$16 sps:$4 sm:$0xff]   ;;  %v4090_v30 = vld [vmem:[%s5981_s1 + $0x5c0] ss:$16 sps:$4 sm:$0xff]   ;;  %v263_v42 = vld [vmem:[%s4562_s26 + $0x2b8] sm:$0xff] }
  0x42   : > { %1681 = vmatpush2.bf16.msra.mxu1 %v4035_v51  ;;  %1569 = vmatprep.subr.bf16.mxu0 %v4036_v52  ;;  %v4075_v51 = vld [vmem:[%s5981_s1 + $0x460] ss:$16 sps:$4 sm:$0xff]   ;;  %v4722_v52 = vpack.c.bf16 %v226_v46, %v219_v45 }
  0x43   : > { %1682 = vmatprep.subr.bf16.mxu1 %v4038_v55  ;;  %v4080_v55 = vld [vmem:[%s5981_s1 + $0x444] ss:$16 sps:$4 sm:$0xff]   ;;  %v4093_v46 = vld [vmem:[%s5981_s1 + $0x5a0] ss:$16 sps:$4 sm:$0xff]  }
  0x44   : > { %v246_v31 = vld [vmem:[%s4562_s26 + $0x230] sm:$0xff]  ;;  %v268_v41 = vld [vmem:[%s4562_s26 + $0x2e0] sm:$0xff] }
  0x45   : > { %1570 = vmatpush2.bf16.msra.mxu0 %v4040_v56  ;;  %v4727_v56 = vpack.c.bf16 %v228_v48, %v221_v47  ;;  %v270_v43 = vld [vmem:[%s4562_s26 + $0x2f0] sm:$0xff]  ;;  %v4821_v47 = vpack.c.bf16 %v268_v41, %v261_v40  ;;  %v189_v41 = vld [vmem:[%s4562_s26 + $0x68] sm:$0xff] }
  0x46   : > { %1683 = vmatpush2.bf16.msra.mxu1 %v4041_v57  ;;  %1571 = vmatprep.subr.bf16.mxu0 %v4042_v58  ;;  %v4078_v57 = vld [vmem:[%s5981_s1 + $0x440] ss:$16 sps:$4 sm:$0xff]   ;;  %v4098_v48 = vld [vmem:[%s5981_s1 + $0x584] ss:$16 sps:$4 sm:$0xff]  }
  0x47   : > { %1684 = vmatprep.subr.bf16.mxu1 %v4044_v59  ;;  %v218_v58 = vld [vmem:[%s4562_s26 + $0x150] sm:$0xff]  ;;  %v225_v59 = vld [vmem:[%s4562_s26 + $0x188] sm:$0xff] }
  0x48   : > { %v182_v40 = vld [vmem:[%s4562_s26 + $0x30] sm:$0xff] }
  0x49   : > { %1572 = vmatpush2.bf16.msra.mxu0 %v4046_v60  ;;  %v220_v60 = vld [vmem:[%s4562_s26 + $0x160] sm:$0xff] }
  0x4a   : > { %1685 = vmatpush2.bf16.msra.mxu1 %v4047_v61  ;;  %1573 = vmatprep.subr.bf16.mxu0 %v4048_v62  ;;  %v227_v61 = vld [vmem:[%s4562_s26 + $0x198] sm:$0xff]  ;;  %v4083_v62 = vld [vmem:[%s5981_s1 + $0x424] ss:$16 sps:$4 sm:$0xff]  }
  0x4b   : > { %1686 = vmatprep.subr.bf16.mxu1 %v4050_v63  ;;  %v233_v63 = vld [vmem:[%s4562_s26 + $0x1c8] sm:$0xff] }
  0x4d   : > { %1574 = vmatpush2.bf16.msra.mxu0 %v4052_v0  ;;  %v240_v0 = vld [vmem:[%s4562_s26 + $0x200] sm:$0xff] }
  0x4e   : > { %1687 = vmatpush2.bf16.msra.mxu1 %v4053_v1  ;;  %1575 = vmatprep.subr.bf16.mxu0 %v4054_v2  ;;  %v235_v1 = vld [vmem:[%s4562_s26 + $0x1d8] sm:$0xff]  ;;  %v242_v2 = vld [vmem:[%s4562_s26 + $0x210] sm:$0xff]  ;;  %v4754_v6 = vpack.c.bf16 %v240_v0, %v233_v63  ;;  %v277_v0 = vld [vmem:[%s4562_s26 + $0x328] sm:$0xff] }
  0x4f   : > { %1688 = vmatprep.subr.bf16.mxu1 %v4056_v3  ;;  %v4747_v3 = vpack.c.bf16 %v225_v59, %v218_v58  ;;  %v4759_v8 = vpack.c.bf16 %v242_v2, %v235_v1  ;;  %v267_v58 = vld [vmem:[%s4562_s26 + $0x2d8] sm:$0xff]  ;;  %v262_v59 = vld [vmem:[%s4562_s26 + $0x2b0] sm:$0xff]  ;;  %v284_v1 = vld [vmem:[%s4562_s26 + $0x360] sm:$0xff] }
  0x50   : > { %v282_v63 = vld [vmem:[%s4562_s26 + $0x350] sm:$0xff] }
  0x51   : > { %1576 = vmatpush2.bf16.msra.mxu0 %v4058_v4  ;;  %v4749_v4 = vpack.c.bf16 %v227_v61, %v220_v60  ;;  %v269_v60 = vld [vmem:[%s4562_s26 + $0x2e8] sm:$0xff]  ;;  %v4101_v61 = vld [vmem:[%s5981_s1 + $0x564] ss:$16 sps:$4 sm:$0xff]  }
  0x52   : > { %1689 = vmatpush2.bf16.msra.mxu1 %v4059_v5  ;;  %1771 = vmatprep.subr.bf16.mxu0 %v4062_v10  ;;  %v4081_v5 = vld [vmem:[%s5981_s1 + $0x420] ss:$16 sps:$4 sm:$0xff]  }
  0x53   : > { %1898 = vmatprep.subr.bf16.mxu1 %v4065_v11  ;;  %v232_v10 = vld [vmem:[%s4562_s26 + $0x1c0] sm:$0xff]  ;;  %v239_v11 = vld [vmem:[%s4562_s26 + $0x1f8] sm:$0xff] }
  0x54   : > { %1578 = vmatmul.mubr.bf16.vlgmr.msra.gmra.mxu0 %v4649_v15  ;;  %v4782_v24 = vpack.c.bf16 %v239_v11, %v232_v10  ;;  %v4104_v10 = vld [vmem:[%s5981_s1 + $0x544] ss:$16 sps:$4 sm:$0xff]   ;;  %v4858_v11 = vpack.c.bf16 %v284_v1, %v277_v0  ;;  %v4120_v0 = vld [vmem:[%s5981_s1 + $0x2c8] ss:$16 sps:$4 sm:$0xff]  }
  0x55   : > { %1691 = vmatmul.mubr.bf16.vlgmr.msra.gmra.mxu1 %v4651_v16  ;;  %1772 = vmatpush1.bf16.msra.mxu0 %v4060_v12  ;;  %v234_v12 = vld [vmem:[%s4562_s26 + $0x1d0] sm:$0xff] }
  0x56   : > { %1899 = vmatpush1.bf16.msra.mxu1 %v4063_v19  ;;  %1773 = vmatprep.subr.bf16.mxu0 %v4068_v20  ;;  %v254_v19 = vld [vmem:[%s4562_s26 + $0x270] sm:$0xff]  ;;  %v249_v20 = vld [vmem:[%s4562_s26 + $0x248] sm:$0xff]  ;;  %v4784_v25 = vpack.c.bf16 %v241_v14, %v234_v12 }
  0x57   : > { %1587 = vmatprep.mubr.bf16.mxu0 %v4661_v21  ;;  %1700 = vmatprep.mubr.bf16.mxu1 %v4666_v23  ;;  %v4789_v27 = vpack.c.bf16 %v254_v19, %v247_v18  ;;  %v4102_v12 = vld [vmem:[%s5981_s1 + $0x540] ss:$16 sps:$4 sm:$0xff]   ;;  %v281_v14 = vld [vmem:[%s4562_s26 + $0x348] sm:$0xff]  ;;  %v283_v18 = vld [vmem:[%s4562_s26 + $0x358] sm:$0xff] }
  0x58   : > { %2110 = vmatprep.subr.bf16.mxu1 %v4116_v13  ;;  %v274_v13 = vld [vmem:[%s4562_s26 + $0x310] sm:$0xff] }
  0x59   : > { %1774 = vmatpush1.bf16.msra.mxu0 %v4066_v22  ;;  %v256_v22 = vld [vmem:[%s4562_s26 + $0x280] sm:$0xff]  ;;  %v194_v1 = vld [vmem:[%s4562_s26 + $0x90] sm:$0xff] }
  0x5a   : > { %1775 = vmatprep.subr.bf16.mxu0 %v4071_v28  ;;  %v4092_v28 = vld [vmem:[%s5981_s1 + $0x5c4] ss:$16 sps:$4 sm:$0xff]   ;;  %v4794_v29 = vpack.c.bf16 %v256_v22, %v249_v20  ;;  %v181_v20 = vld [vmem:[%s4562_s26 + $0x28] sm:$0xff] }
  0x5b   : > { %v4107_v19 = vld [vmem:[%s5981_s1 + $0x524] ss:$16 sps:$4 sm:$0xff]  }
  0x5c   : > { %1588 = vmatmul.mubr.bf16.gmra.mxu0 %v4683_v33  ;;  %v188_v22 = vld [vmem:[%s4562_s26 + $0x60] sm:$0xff] }
  0x5d   : > { %1701 = vmatmul.mubr.bf16.gmra.mxu1 %v4685_v34  ;;  %1776 = vmatpush1.bf16.msra.mxu0 %v4069_v35  ;;  %v248_v35 = vld [vmem:[%s4562_s26 + $0x240] sm:$0xff] }
  0x5e   : > { %1597 = vmatprep.mubr.bf16.mxu0 %v4690_v36  ;;  %1777 = vmatprep.subr.bf16.mxu0 %v4074_v37  ;;  %v255_v37 = vld [vmem:[%s4562_s26 + $0x278] sm:$0xff] }
  0x5f   : > { %1710 = vmatprep.mubr.bf16.mxu1 %v4695_v38  ;;  %v4816_v45 = vpack.c.bf16 %v255_v37, %v248_v35  ;;  %v4108_v35 = vld [vmem:[%s5981_s1 + $0x500] ss:$16 sps:$4 sm:$0xff]  }
  0x60   : > { %v180_v37 = vld [vmem:[%s4562_s26 + $0x20] sm:$0xff] }
  0x61   : > { %1778 = vmatpush1.bf16.msra.mxu0 %v4072_v39  ;;  %v4095_v39 = vld [vmem:[%s5981_s1 + $0x5a4] ss:$16 sps:$4 sm:$0xff]  }
  0x62   : > { %1779 = vmatprep.subr.bf16.mxu0 %v4077_v44  ;;  %v4814_v44 = vpack.c.bf16 %v253_v32, %v246_v31  ;;  %v4883_v31 = vpack.c.bf16 %v188_v22, %v181_v20  ;;  %v4110_v32 = vld [vmem:[%s5981_s1 + $0x504] ss:$16 sps:$4 sm:$0xff]   ;;  %v4123_v22 = vld [vmem:[%s5981_s1 + $0xa8] ss:$16 sps:$4 sm:$0xff]  }
  0x63   : > { %v216_v20 = vld [vmem:[%s4562_s26 + $0x140] sm:$0xff] }
  0x64   : > { %1598 = vmatmul.mubr.bf16.gmra.mxu0 %v4715_v49 }
  0x65   : > { %1711 = vmatmul.mubr.bf16.gmra.mxu1 %v4717_v50  ;;  %1780 = vmatpush1.bf16.msra.mxu0 %v4075_v51  ;;  %v4826_v51 = vpack.c.bf16 %v270_v43, %v263_v42  ;;  %v5984_v42 = vmov 0   ;;  %v4113_v43 = vld [vmem:[%s5981_s1 + $0xec] ss:$16 sps:$4 sm:$0xff]  }
  0x66   : > { %1607 = vmatprep.mubr.bf16.mxu0 %v4722_v52  ;;  %1781 = vmatprep.subr.bf16.mxu0 %v4080_v55  ;;  %v4096_v55 = vld [vmem:[%s5981_s1 + $0x580] ss:$16 sps:$4 sm:$0xff]  }
  0x67   : > { %1720 = vmatprep.mubr.bf16.mxu1 %v4727_v56 }
  0x69   : > { %1782 = vmatpush1.bf16.msra.mxu0 %v4078_v57  ;;  %v260_v57 = vld [vmem:[%s4562_s26 + $0x2a0] sm:$0xff] }
  0x6a   : > { %1783 = vmatprep.subr.bf16.mxu0 %v4083_v62  ;;  %v275_v62 = vld [vmem:[%s4562_s26 + $0x318] sm:$0xff]  ;;  %v4846_v2 = vpack.c.bf16 %v267_v58, %v260_v57  ;;  %v4910_v57 = vpack.c.bf16 %v189_v41, %v182_v40  ;;  %v208_v41 = vld [vmem:[%s4562_s26 + $0x100] sm:$0xff] }
  0x6b   : > { %v195_v58 = vld [vmem:[%s4562_s26 + $0x98] sm:$0xff] }
  0x6c   : > { %1608 = vmatmul.mubr.bf16.gmra.mxu0 %v4747_v3 }
  0x6d   : > { %1721 = vmatmul.mubr.bf16.gmra.mxu1 %v4749_v4  ;;  %1784 = vmatpush1.bf16.msra.mxu0 %v4081_v5  ;;  %v4848_v5 = vpack.c.bf16 %v269_v60, %v262_v59  ;;  %v202_v59 = vld [vmem:[%s4562_s26 + $0xd0] sm:$0xff]  ;;  %v4119_v60 = vld [vmem:[%s5981_s1 + $0xcc] ss:$16 sps:$4 sm:$0xff]  }
  0x6e   : > { %1617 = vmatprep.mubr.bf16.mxu0 %v4754_v6  ;;  %1785 = vmatprep.subr.bf16.mxu0 %v4086_v7  ;;  %v4099_v7 = vld [vmem:[%s5981_s1 + $0x560] ss:$16 sps:$4 sm:$0xff]  }
  0x6f   : > { %1730 = vmatprep.mubr.bf16.mxu1 %v4759_v8 }
  0x71   : > { %1786 = vmatpush1.bf16.msra.mxu0 %v4084_v9  ;;  %v4853_v9 = vpack.c.bf16 %v282_v63, %v275_v62  ;;  %v4117_v62 = vld [vmem:[%s5981_s1 + $0xc8] ss:$16 sps:$4 sm:$0xff]   ;;  %v4923_v63 = vpack.c.bf16 %v202_v59, %v195_v58  ;;  %v4137_v58 = vld [vmem:[%s5981_s1 + $0x6c] ss:$16 sps:$4 sm:$0xff]  }
  0x72   : > { %1787 = vmatprep.subr.bf16.mxu0 %v4089_v17  ;;  %v276_v17 = vld [vmem:[%s4562_s26 + $0x320] sm:$0xff]  ;;  %v4140_v59 = vld [vmem:[%s5981_s1 + $0x26c] ss:$16 sps:$4 sm:$0xff]  }
  0x74   : > { %1618 = vmatmul.mubr.bf16.gmra.mxu0 %v4782_v24 }
  0x75   : > { %1731 = vmatmul.mubr.bf16.gmra.mxu1 %v4784_v25  ;;  %1788 = vmatpush2.bf16.msra.mxu0 %v4087_v26  ;;  %v4876_v26 = vpack.c.bf16 %v281_v14, %v274_v13  ;;  %v4125_v13 = vld [vmem:[%s5981_s1 + $0xac] ss:$16 sps:$4 sm:$0xff]  }
  0x76   : > { %1627 = vmatprep.mubr.bf16.mxu0 %v4789_v27  ;;  %1789 = vmatprep.subr.bf16.mxu0 %v4092_v28  ;;  %v4878_v28 = vpack.c.bf16 %v283_v18, %v276_v17  ;;  %v4128_v14 = vld [vmem:[%s5981_s1 + $0x2ac] ss:$16 sps:$4 sm:$0xff]  }
  0x77   : > { %1740 = vmatprep.mubr.bf16.mxu1 %v4794_v29  ;;  %v209_v17 = vld [vmem:[%s4562_s26 + $0x108] sm:$0xff] }
  0x78   : > { %v4967_v40 = vpack.c.bf16 %v216_v20, %v209_v17  ;;  %v222_v20 = vld [vmem:[%s4562_s26 + $0x170] sm:$0xff] }
  0x79   : > { %1790 = vmatpush2.bf16.msra.mxu0 %v4090_v30  ;;  %v4105_v30 = vld [vmem:[%s5981_s1 + $0x520] ss:$16 sps:$4 sm:$0xff]  }
  0x7a   : > { %1791 = vmatprep.subr.bf16.mxu0 %v4095_v39  ;;  %v187_v39 = vld [vmem:[%s4562_s26 + $0x58] sm:$0xff] }
  0x7c   : > { %1628 = vmatmul.mubr.bf16.gmra.mxu0 %v4814_v44 }
  0x7d   : > { %1741 = vmatmul.mubr.bf16.gmra.mxu1 %v4816_v45  ;;  %1792 = vmatpush2.bf16.msra.mxu0 %v4093_v46  ;;  %v4111_v46 = vld [vmem:[%s5981_s1 + $0xe8] ss:$16 sps:$4 sm:$0xff]  }
  0x7e   : > { %1637 = vmatprep.mubr.bf16.mxu0 %v4821_v47  ;;  %1793 = vmatprep.subr.bf16.mxu0 %v4098_v48  ;;  %v4114_v48 = vld [vmem:[%s5981_s1 + $0x2e8] ss:$16 sps:$4 sm:$0xff]  }
  0x7f   : > { %1750 = vmatprep.mubr.bf16.mxu1 %v4826_v51 }
  0x81   : > { %1794 = vmatpush2.bf16.msra.mxu0 %v4096_v55  ;;  %v4908_v55 = vpack.c.bf16 %v187_v39, %v180_v37  ;;  %v4129_v37 = vld [vmem:[%s5981_s1 + $0x88] ss:$16 sps:$4 sm:$0xff]  }
  0x82   : > { %1795 = vmatprep.subr.bf16.mxu0 %v4101_v61  ;;  %v4122_v61 = vld [vmem:[%s5981_s1 + $0x2cc] ss:$16 sps:$4 sm:$0xff]   ;;  %v4132_v39 = vld [vmem:[%s5981_s1 + $0x288] ss:$16 sps:$4 sm:$0xff]  }
  0x84   : > { %1638 = vmatmul.mubr.bf16.gmra.mxu0 %v4846_v2 }
  0x85   : > { %1751 = vmatmul.mubr.bf16.gmra.mxu1 %v4848_v5  ;;  %1796 = vmatpush2.bf16.msra.mxu0 %v4099_v7  ;;  %v201_v7 = vld [vmem:[%s4562_s26 + $0xc8] sm:$0xff] }
  0x86   : > { %1647 = vmatprep.mubr.bf16.mxu0 %v4853_v9  ;;  %1797 = vmatprep.subr.bf16.mxu0 %v4104_v10  ;;  %v196_v10 = vld [vmem:[%s4562_s26 + $0xa0] sm:$0xff]  ;;  %v4944_v18 = vpack.c.bf16 %v201_v7, %v194_v1  ;;  %v223_v1 = vld [vmem:[%s4562_s26 + $0x178] sm:$0xff]  ;;  %v230_v7 = vld [vmem:[%s4562_s26 + $0x1b0] sm:$0xff] }
  0x87   : > { %1760 = vmatprep.mubr.bf16.mxu1 %v4858_v11  ;;  %v5008_v17 = vpack.c.bf16 %v230_v7, %v223_v1  ;;  %v4156_v1 = vld [vmem:[%s5981_s1 + $0x208] ss:$16 sps:$4 sm:$0xff]  }
  0x89   : > { %1798 = vmatpush2.bf16.msra.mxu0 %v4102_v12  ;;  %v203_v12 = vld [vmem:[%s4562_s26 + $0xd8] sm:$0xff] }
  0x8a   : > { %1799 = vmatprep.subr.bf16.mxu0 %v4107_v19  ;;  %v4946_v19 = vpack.c.bf16 %v203_v12, %v196_v10  ;;  %v4143_v10 = vld [vmem:[%s5981_s1 + $0x4c] ss:$16 sps:$4 sm:$0xff]  }
  0x8b   : > { %v4146_v12 = vld [vmem:[%s5981_s1 + $0x24c] ss:$16 sps:$4 sm:$0xff]  }
  0x8c   : > { %1648 = vmatmul.mubr.bf16.gmra.mxu0 %v4876_v26 }
  0x8d   : > { %1761 = vmatmul.mubr.bf16.gmra.mxu1 %v4878_v28  ;;  %1800 = vmatpush2.bf16.msra.mxu0 %v4105_v30  ;;  %v4126_v30 = vld [vmem:[%s5981_s1 + $0x2a8] ss:$16 sps:$4 sm:$0xff]  }
  0x8e   : > { %1803 = vmatprep.mubr.bf16.mxu0 %v4883_v31  ;;  %1801 = vmatprep.subr.bf16.mxu0 %v4110_v32  ;;  %v4131_v32 = vld [vmem:[%s5981_s1 + $0x8c] ss:$16 sps:$4 sm:$0xff]  }
  0x8f   : > { %1916 = vmatprep.mubr.bf16.mxu1 %v5984_v42 }
  0x91   : > { %1802 = vmatpush2.bf16.msra.mxu0 %v4108_v35  ;;  %v4134_v35 = vld [vmem:[%s5981_s1 + $0x28c] ss:$16 sps:$4 sm:$0xff]  }
  0x92   : > { %1997 = vmatprep.subr.bf16.mxu0 %v4113_v43  ;;  %v215_v43 = vld [vmem:[%s4562_s26 + $0x138] sm:$0xff] }
  0x94   : > { %1804 = vmatmul.mubr.bf16.vlgmr.msra.gmra.mxu0 %v4908_v55 }
  0x95   : > { %3530 = vmatmul.mubr.msk.bf16.vlgmr.msra.gmra.mxu1 %vm1520_vm0, %v4910_v57  ;;  %1998 = vmatpush1.bf16.msra.mxu0 %v4111_v46  ;;  %v210_v46 = vld [vmem:[%s4562_s26 + $0x110] sm:$0xff] }
  0x96   : > { %2111 = vmatpush1.bf16.msra.mxu1 %v4114_v48  ;;  %1999 = vmatprep.subr.bf16.mxu0 %v4119_v60  ;;  %v217_v48 = vld [vmem:[%s4562_s26 + $0x148] sm:$0xff] }
  0x97   : > { %2112 = vmatprep.subr.bf16.mxu1 %v4122_v61  ;;  %1813 = vmatprep.mubr.bf16.mxu0 %v4923_v63  ;;  %v4135_v60 = vld [vmem:[%s5981_s1 + $0x68] ss:$16 sps:$4 sm:$0xff]  }
  0x98   : > { %1926 = vmatprep.mubr.bf16.mxu1 %v5984_v42  ;;  %v4138_v61 = vld [vmem:[%s5981_s1 + $0x268] ss:$16 sps:$4 sm:$0xff]  }
  0x99   : > { %2000 = vmatpush1.bf16.msra.mxu0 %v4117_v62  ;;  %v4990_v62 = vpack.c.bf16 %v215_v43, %v208_v41  ;;  %v4150_v41 = vld [vmem:[%s5981_s1 + $0x228] ss:$16 sps:$4 sm:$0xff]  }
  0x9a   : > { %2113 = vmatpush1.bf16.msra.mxu1 %v4120_v0  ;;  %2001 = vmatprep.subr.bf16.mxu0 %v4125_v13  ;;  %v4992_v0 = vpack.c.bf16 %v217_v48, %v210_v46  ;;  %v4141_v13 = vld [vmem:[%s5981_s1 + $0x48] ss:$16 sps:$4 sm:$0xff]  }
  0x9b   : > { %2114 = vmatprep.subr.bf16.mxu1 %v4128_v14  ;;  %v4144_v14 = vld [vmem:[%s5981_s1 + $0x248] ss:$16 sps:$4 sm:$0xff]  }
  0x9c   : > { %1814 = vmatmul.mubr.bf16.gmra.mxu0 %v4944_v18  ;;  %v237_v48 = vld [vmem:[%s4562_s26 + $0x1e8] sm:$0xff] }
  0x9d   : > { %3531 = vmatmul.mubr.msk.bf16.gmra.mxu1 %vm1520_vm0, %v4946_v19  ;;  %2002 = vmatpush1.bf16.msra.mxu0 %v4123_v22  ;;  %v229_v22 = vld [vmem:[%s4562_s26 + $0x1a8] sm:$0xff] }
  0x9e   : > { %2115 = vmatpush1.bf16.msra.mxu1 %v4126_v30  ;;  %2003 = vmatprep.subr.bf16.mxu0 %v4131_v32  ;;  %v224_v30 = vld [vmem:[%s4562_s26 + $0x180] sm:$0xff]  ;;  %v231_v32 = vld [vmem:[%s4562_s26 + $0x1b8] sm:$0xff]  ;;  %v5031_v43 = vpack.c.bf16 %v229_v22, %v222_v20 }
  0x9f   : > { %2116 = vmatprep.subr.bf16.mxu1 %v4134_v35  ;;  %1823 = vmatprep.mubr.bf16.mxu0 %v4967_v40  ;;  %v4149_v35 = vld [vmem:[%s5981_s1 + $0x2c] ss:$16 sps:$4 sm:$0xff]   ;;  %v5033_v46 = vpack.c.bf16 %v231_v32, %v224_v30  ;;  %v4159_v30 = vld [vmem:[%s5981_s1 + $0x1e8] ss:$16 sps:$4 sm:$0xff]  }
  0xa0   : > { %1936 = vmatprep.mubr.bf16.mxu1 %v5984_v42  ;;  %v4161_v20 = vld [vmem:[%s5981_s1 + $0x1ec] ss:$16 sps:$4 sm:$0xff]   ;;  %v4162_v32 = vld [vmem:[%s5981_s1 + $0x3e8] ss:$16 sps:$4 sm:$0xff]  }
  0xa1   : > { %2004 = vmatpush1.bf16.msra.mxu0 %v4129_v37  ;;  %v4152_v37 = vld [vmem:[%s5981_s1 + $0x22c] ss:$16 sps:$4 sm:$0xff]  }
  0xa2   : > { %2117 = vmatpush1.bf16.msra.mxu1 %v4132_v39  ;;  %2005 = vmatprep.subr.bf16.mxu0 %v4137_v58  ;;  %v4147_v39 = vld [vmem:[%s5981_s1 + $0x28] ss:$16 sps:$4 sm:$0xff]   ;;  %v244_v58 = vld [vmem:[%s4562_s26 + $0x220] sm:$0xff]  ;;  %v4164_v22 = vld [vmem:[%s5981_s1 + $0x3ec] ss:$16 sps:$4 sm:$0xff]  }
  0xa3   : > { %2118 = vmatprep.subr.bf16.mxu1 %v4140_v59  ;;  %v4155_v59 = vld [vmem:[%s5981_s1 + $0xc] ss:$16 sps:$4 sm:$0xff]   ;;  %v5049_v7 = vpack.c.bf16 %v244_v58, %v237_v48 }
  0xa4   : > { %1824 = vmatmul.mubr.bf16.gmra.mxu0 %v4990_v62  ;;  %v4167_v48 = vld [vmem:[%s5981_s1 + $0x1cc] ss:$16 sps:$4 sm:$0xff]  }
  0xa5   : > { %3532 = vmatmul.mubr.msk.bf16.gmra.mxu1 %vm1520_vm0, %v4992_v0  ;;  %2006 = vmatpush1.bf16.msra.mxu0 %v4135_v60  ;;  %v4158_v60 = vld [vmem:[%s5981_s1 + $0x20c] ss:$16 sps:$4 sm:$0xff]  }
  0xa6   : > { %2119 = vmatpush1.bf16.msra.mxu1 %v4138_v61  ;;  %2007 = vmatprep.subr.bf16.mxu0 %v4143_v10  ;;  %v4153_v61 = vld [vmem:[%s5981_s1 + $0x8] ss:$16 sps:$4 sm:$0xff]   ;;  %v236_v10 = vld [vmem:[%s4562_s26 + $0x1e0] sm:$0xff]  ;;  %v4170_v58 = vld [vmem:[%s5981_s1 + $0x3cc] ss:$16 sps:$4 sm:$0xff]  }
  0xa7   : > { %2120 = vmatprep.subr.bf16.mxu1 %v4146_v12  ;;  %1833 = vmatprep.mubr.bf16.mxu0 %v5008_v17  ;;  %v243_v12 = vld [vmem:[%s4562_s26 + $0x218] sm:$0xff] }
  0xa8   : > { %1946 = vmatprep.mubr.bf16.mxu1 %v5984_v42 }
  0xa9   : > { %2008 = vmatpush1.bf16.msra.mxu0 %v4141_v13  ;;  %v238_v13 = vld [vmem:[%s4562_s26 + $0x1f0] sm:$0xff] }
  0xaa   : > { %2121 = vmatpush1.bf16.msra.mxu1 %v4144_v14  ;;  %2009 = vmatprep.subr.bf16.mxu0 %v4149_v35  ;;  %v245_v14 = vld [vmem:[%s4562_s26 + $0x228] sm:$0xff]  ;;  %v5072_v35 = vpack.c.bf16 %v243_v12, %v236_v10  ;;  %v252_v12 = vld [vmem:[%s4562_s26 + $0x260] sm:$0xff] }
  0xab   : > { %2122 = vmatprep.subr.bf16.mxu1 %v4152_v37  ;;  %v5074_v37 = vpack.c.bf16 %v245_v14, %v238_v13  ;;  %v257_v10 = vld [vmem:[%s4562_s26 + $0x288] sm:$0xff]  ;;  %v259_v13 = vld [vmem:[%s4562_s26 + $0x298] sm:$0xff] }
  0xac   : > { %1834 = vmatmul.mubr.bf16.gmra.mxu0 %v5031_v43  ;;  %5996 = vst [vmem:[#allocation5_spill] sm:$0xff] %v5072_v35  ;;  %v4173_v14 = vld [vmem:[%s5981_s1 + $0x1ac] ss:$16 sps:$4 sm:$0xff]  }
  0xad   : > { %3533 = vmatmul.mubr.msk.bf16.gmra.mxu1 %vm1520_vm0, %v5033_v46  ;;  %2010 = vmatpush1.bf16.msra.mxu0 %v4147_v39  ;;  %5997 = vst [vmem:[#allocation6_spill] sm:$0xff] %v5074_v37  ;;  %v251_v39 = vld [vmem:[%s4562_s26 + $0x258] sm:$0xff] }
  0xae   : > { %2123 = vmatpush1.bf16.msra.mxu1 %v4150_v41  ;;  %2011 = vmatprep.subr.bf16.mxu0 %v4155_v59  ;;  %v258_v41 = vld [vmem:[%s4562_s26 + $0x290] sm:$0xff]  ;;  %v4165_v59 = vld [vmem:[%s5981_s1 + $0x1c8] ss:$16 sps:$4 sm:$0xff]  }
  0xaf   : > { %2124 = vmatprep.subr.bf16.mxu1 %v4158_v60  ;;  %1843 = vmatprep.mubr.bf16.mxu0 %v5049_v7  ;;  %v4168_v60 = vld [vmem:[%s5981_s1 + $0x3c8] ss:$16 sps:$4 sm:$0xff]  }
  0xb0   : > { %1956 = vmatprep.mubr.bf16.mxu1 %v5984_v42 }
  0xb1   : > { %2012 = vmatpush1.bf16.msra.mxu0 %v4153_v61  ;;  %v5090_v61 = vpack.c.bf16 %v258_v41, %v251_v39  ;;  %v5115_v39 = vpack.c.bf16 %v259_v13, %v252_v12  ;;  %v4179_v41 = vld [vmem:[%s5981_s1 + $0x18c] ss:$16 sps:$4 sm:$0xff]   ;;  %v264_v13 = vld [vmem:[%s4562_s26 + $0x2c0] sm:$0xff] }
  0xb2   : > { %2125 = vmatpush1.bf16.msra.mxu1 %v4156_v1  ;;  %2013 = vmatprep.subr.bf16.mxu0 %v4161_v20  ;;  %v250_v1 = vld [vmem:[%s4562_s26 + $0x250] sm:$0xff]  ;;  %v4176_v20 = vld [vmem:[%s5981_s1 + $0x3ac] ss:$16 sps:$4 sm:$0xff]  }
  0xb3   : > { %2126 = vmatprep.subr.bf16.mxu1 %v4164_v22  ;;  %5998 = vst [vmem:[#allocation7_spill] sm:$0xff] %v5090_v61  ;;  %v4171_v22 = vld [vmem:[%s5981_s1 + $0x1a8] ss:$16 sps:$4 sm:$0xff]   ;;  %5999 = vst [vmem:[#allocation8_spill] sm:$0xff] %v5115_v39 }
  0xb4   : > { %1844 = vmatmul.mubr.bf16.gmra.mxu0 %v5072_v35  ;;  %v273_v35 = vld [vmem:[%s4562_s26 + $0x308] sm:$0xff] }
  0xb5   : > { %3534 = vmatmul.mubr.msk.bf16.gmra.mxu1 %vm1520_vm0, %v5074_v37  ;;  %2014 = vmatpush2.bf16.msra.mxu0 %v4159_v30  ;;  %v4174_v30 = vld [vmem:[%s5981_s1 + $0x3a8] ss:$16 sps:$4 sm:$0xff]   ;;  %v266_v37 = vld [vmem:[%s4562_s26 + $0x2d0] sm:$0xff] }
  0xb6   : > { %2127 = vmatpush2.bf16.msra.mxu1 %v4162_v32  ;;  %2015 = vmatprep.subr.bf16.mxu0 %v4167_v48  ;;  %v5113_v32 = vpack.c.bf16 %v257_v10, %v250_v1  ;;  %v4182_v48 = vld [vmem:[%s5981_s1 + $0x38c] ss:$16 sps:$4 sm:$0xff]   ;;  %v4177_v1 = vld [vmem:[%s5981_s1 + $0x188] ss:$16 sps:$4 sm:$0xff]  }
  0xb7   : > { %2128 = vmatprep.subr.bf16.mxu1 %v4170_v58  ;;  %1853 = vmatprep.mubr.bf16.mxu0 %v5090_v61  ;;  %v265_v58 = vld [vmem:[%s4562_s26 + $0x2c8] sm:$0xff]  ;;  %v271_v61 = vld [vmem:[%s4562_s26 + $0x2f8] sm:$0xff] }
  0xb8   : > { %1966 = vmatprep.mubr.bf16.mxu1 %v5984_v42  ;;  %v272_v42 = vld [vmem:[%s4562_s26 + $0x300] sm:$0xff]  ;;  %v4180_v10 = vld [vmem:[%s5981_s1 + $0x388] ss:$16 sps:$4 sm:$0xff]  }
  0xb9   : > { %2016 = vmatpush2.bf16.msra.mxu0 %v4165_v59  ;;  %v5131_v12 = vpack.c.bf16 %v272_v42, %v265_v58  ;;  %v4185_v59 = vld [vmem:[%s5981_s1 + $0x16c] ss:$16 sps:$4 sm:$0xff]   ;;  %v4186_v58 = vld [vmem:[%s5981_s1 + $0x368] ss:$16 sps:$4 sm:$0xff]  }
  0xba   : > { %2129 = vmatpush2.bf16.msra.mxu1 %v4168_v60  ;;  %2017 = vmatprep.subr.bf16.mxu0 %v4173_v14  ;;  %v4188_v60 = vld [vmem:[%s5981_s1 + $0x36c] ss:$16 sps:$4 sm:$0xff]   ;;  %v6001_v14 = vmov 0  }
  0xbb   : > { %2130 = vmatprep.subr.bf16.mxu1 %v4176_v20  ;;  %6000 = vst [vmem:[#allocation9_spill] sm:$0xff] %v5131_v12  ;;  %v279_v42 = vld [vmem:[%s4562_s26 + $0x338] sm:$0xff] }
  0xbc   : > { %1854 = vmatmul.mubr.bf16.gmra.mxu0 %v5113_v32  ;;  %v4183_v20 = vld [vmem:[%s5981_s1 + $0x168] ss:$16 sps:$4 sm:$0xff]  }
  0xbd   : > { %3535 = vmatmul.mubr.msk.bf16.gmra.mxu1 %vm1520_vm0, %v5115_v39  ;;  %2018 = vmatpush2.bf16.msra.mxu0 %v4171_v22  ;;  %v5155_v22 = vpack.c.bf16 %v271_v61, %v264_v13  ;;  %v4189_v61 = vld [vmem:[%s5981_s1 + $0x148] ss:$16 sps:$4 sm:$0xff]   ;;  %v278_v13 = vld [vmem:[%s4562_s26 + $0x330] sm:$0xff] }
  0xbe   : > { %2131 = vmatpush2.bf16.msra.mxu1 %v4174_v30  ;;  %2019 = vmatprep.subr.bf16.mxu0 %v4179_v41  ;;  %v5157_v30 = vpack.c.bf16 %v273_v35, %v266_v37  ;;  %v4191_v41 = vld [vmem:[%s5981_s1 + $0x14c] ss:$16 sps:$4 sm:$0xff]   ;;  %v4192_v35 = vld [vmem:[%s5981_s1 + $0x348] ss:$16 sps:$4 sm:$0xff]  }
  0xbf   : > { %2132 = vmatprep.subr.bf16.mxu1 %v4182_v48  ;;  %1863 = vmatprep.mubr.bf16.mxu0 %v5131_v12  ;;  %v286_v48 = vld [vmem:[%s4562_s26 + $0x370] sm:$0xff]  ;;  %v4194_v12 = vld [vmem:[%s5981_s1 + $0x34c] ss:$16 sps:$4 sm:$0xff]  }
  0xc0   : > { %1976 = vmatprep.mubr.bf16.mxu1 %v6001_v14  ;;  %v5172_v37 = vpack.c.bf16 %v286_v48, %v279_v42  ;;  %v285_v39 = vld [vmem:[%s4562_s26 + $0x368] sm:$0xff] }
  0xc1   : > { %2020 = vmatpush2.bf16.msra.mxu0 %v4177_v1  ;;  %v280_v1 = vld [vmem:[%s4562_s26 + $0x340] sm:$0xff]  ;;  %v4195_v42 = vld [vmem:[%s5981_s1 + $0x128] ss:$16 sps:$4 sm:$0xff]  }
  0xc2   : > { %2133 = vmatpush2.bf16.msra.mxu1 %v4180_v10  ;;  %2021 = vmatprep.subr.bf16.mxu0 %v4185_v59  ;;  %6002 = vst [vmem:[#allocation10_spill] sm:$0xff] %v5172_v37  ;;  %v287_v10 = vld [vmem:[%s4562_s26 + $0x378] sm:$0xff]  ;;  %s164_s26 = sand.u32 1, %s4342_s13  }
  0xc3   : > { %2134 = vmatprep.subr.bf16.mxu1 %v4188_v60  ;;  %v4197_v59 = vld [vmem:[%s5981_s1 + $0x12c] ss:$16 sps:$4 sm:$0xff]   ;;  %v4198_v48 = vld [vmem:[%s5981_s1 + $0x328] ss:$16 sps:$4 sm:$0xff]   ;;  %s3331_s4 = sshll.u32 %s164_s26, 6  ;;  %s5940_s16 = scalar_lea.sflag [#allocation3], %s164_s26 }
  0xc4   : > { %1864 = vmatmul.mubr.bf16.gmra.mxu0 %v5155_v22  ;;  %v4200_v60 = vld [vmem:[%s5981_s1 + $0x32c] ss:$16 sps:$4 sm:$0xff]   ;;  %s5899_s5 = scalar_lea.vmem [#allocation2], %s3331_s4 }
  0xc5   : > { %3536 = vmatmul.mubr.msk.bf16.gmra.mxu1 %vm1520_vm0, %v5157_v30  ;;  %2022 = vmatpush2.bf16.msra.mxu0 %v4183_v20  ;;  %v5195_v20 = vpack.c.bf16 %v285_v39, %v278_v13  ;;  %v4204_v39 = vld [vmem:[%s5981_s1 + $0x308] ss:$16 sps:$4 sm:$0xff]   ;;  %s3265_s7 = sshll.u32 %s5899_s5, 4  ;;  %s5935_s7 = int_to_ptr.vmem [resolvable:$true] %s3265_s7 }
  0xc6   : > { %2135 = vmatpush2.bf16.msra.mxu1 %v4186_v58  ;;  %2023 = vmatprep.subr.bf16.mxu0 %v4191_v41  ;;  %v5197_v58 = vpack.c.bf16 %v287_v10, %v280_v1  ;;  %v4206_v41 = vld [vmem:[%s5981_s1 + $0x30c] ss:$16 sps:$4 sm:$0xff]   ;;  %v4207_v13 = vld [vmem:[%s5981_s1 + $0x4e8] ss:$16 sps:$4 sm:$0xff]   ;;  %s4290_s11 = scalar_lea.vmem %s5935_s7, 1024  ;;  %p4297_p0 = scmp.lt.s32.totalorder %s5935_s7, %s4295_s19 }
  0xc7   : > { %2136 = vmatprep.subr.bf16.mxu1 %v4194_v12  ;;  %1873 = vmatprep.mubr.bf16.mxu0 %v5172_v37  ;;  %v4203_v12 = vld [vmem:[%s5981_s1 + $0x10c] ss:$16 sps:$4 sm:$0xff]   ;;  %v4201_v37 = vld [vmem:[%s5981_s1 + $0x108] ss:$16 sps:$4 sm:$0xff]   ;;  %p4291_p11 = scmp.ne.s32.totalorder %s5935_s7, %s4290_s11  ;;  %p4298_p1 = scmp.lt.s32.totalorder %s4296_s28, %s4290_s11 }
  0xc8   : > { %1986 = vmatprep.mubr.bf16.mxu1 %v6001_v14  ;;  %v4210_v1 = vld [vmem:[%s5981_s1 + $0x608] ss:$16 sps:$4 sm:$0xff]   ;;  %v4215_v10 = vld [vmem:[%s5981_s1 + $0x4cc] ss:$16 sps:$4 sm:$0xff]  }
  0xc9   : > { %2024 = vmatpush2.bf16.msra.mxu0 %v4189_v61  ;;  %v4209_v61 = vld [vmem:[%s5981_s1 + $0x4ec] ss:$16 sps:$4 sm:$0xff]   ;;  %p4292_p12 = pnand %p4291_p11, %p4416_p5  ;;  %p4299_p2 = por %p4298_p1, %p4297_p0 }
  0xca   : > { %2137 = vmatpush2.bf16.msra.mxu1 %v4192_v35  ;;  %2025 = vmatprep.subr.bf16.mxu0 %v4197_v59  ;;  %v4212_v35 = vld [vmem:[%s5981_s1 + $0x60c] ss:$16 sps:$4 sm:$0xff]  }
  0xcb   : > { %2138 = vmatprep.subr.bf16.mxu1 %v4200_v60  ;;  %p4293_p13 = pneg %p4292_p12 }
  0xcc   : > { %1874 = vmatmul.mubr.bf16.gmra.mxu0 %v5195_v20 }
  0xcd   : > { %3537 = vmatmul.mubr.msk.bf16.gmra.mxu1 %vm1520_vm0, %v5197_v58  ;;  %2026 = vmatpush2.bf16.msra.mxu0 %v4195_v42  ;;  %p4300_p3 = pnand %p4299_p2, %p4293_p13 }
  0xce   : > { %2139 = vmatpush2.bf16.msra.mxu1 %v4198_v48  ;;  %2027 = vmatprep.subr.bf16.mxu0 %v4203_v12  ;;  %v4261_v48 = vld [vmem:[%s5982_s2 + $0x30] sm:$0xff]  }
  0xcf   : > { %2140 = vmatprep.subr.bf16.mxu1 %v4206_v41  ;;  %2029 = vmatprep.mubr.bf16.mxu0 %v4583_v53  ;;  %v4213_v53 = vld [vmem:[%s5981_s1 + $0x4c8] ss:$16 sps:$4 sm:$0xff]  }
  0xd0   : > { %2142 = vmatprep.mubr.bf16.mxu1 %v4585_v54  ;;  %v4218_v54 = vld [vmem:[%s5981_s1 + $0x4ac] ss:$16 sps:$4 sm:$0xff]  }
  0xd1   : > { %2028 = vmatpush2.bf16.msra.mxu0 %v4201_v37 }
  0xd2   : > { %2141 = vmatpush2.bf16.msra.mxu1 %v4204_v39  ;;  %2223 = vmatprep.subr.bf16.mxu0 %v4209_v61  ;;  %v4263_v61 = vld [vmem:[%s5982_s2 + $0x28] sm:$0xff]  }
  0xd3   : > { %2350 = vmatprep.subr.bf16.mxu1 %v4212_v35  ;;  %v4264_v35 = vld [vmem:[%s5982_s2 + $0x60] sm:$0xff]  }
  0xd4   : > { %2030 = vmatmul.mubr.bf16.vlgmr.msra.gmra.mxu0 %v4649_v15  ;;  %v4216_v15 = vld [vmem:[%s5981_s1 + $0x4a8] ss:$16 sps:$4 sm:$0xff]  }
  0xd5   : > { %2143 = vmatmul.mubr.bf16.vlgmr.msra.gmra.mxu1 %v4651_v16  ;;  %2224 = vmatpush1.bf16.msra.mxu0 %v4207_v13  ;;  %v4221_v16 = vld [vmem:[%s5981_s1 + $0x48c] ss:$16 sps:$4 sm:$0xff]  }
  0xd6   : > { %2351 = vmatpush1.bf16.msra.mxu1 %v4210_v1  ;;  %2225 = vmatprep.subr.bf16.mxu0 %v4215_v10 }
  0xd7   : > { %2039 = vmatprep.mubr.bf16.mxu0 %v4661_v21  ;;  %2152 = vmatprep.mubr.bf16.mxu1 %v4666_v23  ;;  %v4219_v21 = vld [vmem:[%s5981_s1 + $0x488] ss:$16 sps:$4 sm:$0xff]   ;;  %v4224_v23 = vld [vmem:[%s5981_s1 + $0x46c] ss:$16 sps:$4 sm:$0xff]  }
  0xd9   : > { %2226 = vmatpush1.bf16.msra.mxu0 %v4213_v53 }
  0xda   : > { %2227 = vmatprep.subr.bf16.mxu0 %v4218_v54 }
  0xdc   : > { %2040 = vmatmul.mubr.bf16.gmra.mxu0 %v4683_v33  ;;  %v4222_v33 = vld [vmem:[%s5981_s1 + $0x468] ss:$16 sps:$4 sm:$0xff]  }
  0xdd   : > { %2153 = vmatmul.mubr.bf16.gmra.mxu1 %v4685_v34  ;;  %2228 = vmatpush1.bf16.msra.mxu0 %v4216_v15  ;;  %v4227_v34 = vld [vmem:[%s5981_s1 + $0x44c] ss:$16 sps:$4 sm:$0xff]   ;;  %v4265_v15 = vld [vmem:[%s5982_s2 + $0x20] sm:$0xff]  }
  0xde   : > { %2049 = vmatprep.mubr.bf16.mxu0 %v4690_v36  ;;  %2229 = vmatprep.subr.bf16.mxu0 %v4221_v16  ;;  %v4225_v36 = vld [vmem:[%s5981_s1 + $0x448] ss:$16 sps:$4 sm:$0xff]  }
  0xdf   : > { %2162 = vmatprep.mubr.bf16.mxu1 %v4695_v38  ;;  %v4230_v38 = vld [vmem:[%s5981_s1 + $0x42c] ss:$16 sps:$4 sm:$0xff]  }
  0xe1   : > { %2230 = vmatpush1.bf16.msra.mxu0 %v4219_v21 }
  0xe2   : > { %2231 = vmatprep.subr.bf16.mxu0 %v4224_v23 }
  0xe4   : > { %2050 = vmatmul.mubr.bf16.gmra.mxu0 %v4715_v49  ;;  %v4228_v49 = vld [vmem:[%s5981_s1 + $0x428] ss:$16 sps:$4 sm:$0xff]  }
  0xe5   : > { %2163 = vmatmul.mubr.bf16.gmra.mxu1 %v4717_v50  ;;  %2232 = vmatpush1.bf16.msra.mxu0 %v4222_v33  ;;  %v4233_v50 = vld [vmem:[%s5981_s1 + $0x40c] ss:$16 sps:$4 sm:$0xff]  }
  0xe6   : > { %2059 = vmatprep.mubr.bf16.mxu0 %v4722_v52  ;;  %2233 = vmatprep.subr.bf16.mxu0 %v4227_v34  ;;  %v4231_v52 = vld [vmem:[%s5981_s1 + $0x408] ss:$16 sps:$4 sm:$0xff]   ;;  %v4268_v34 = vld [vmem:[%s5982_s2 + $0x50] sm:$0xff]  }
  0xe7   : > { %2172 = vmatprep.mubr.bf16.mxu1 %v4727_v56  ;;  %v4236_v56 = vld [vmem:[%s5981_s1 + $0x5ec] ss:$16 sps:$4 sm:$0xff]  }
  0xe8   : > { %v4267_v33 = vld [vmem:[%s5982_s2 + $0x18] sm:$0xff]  }
  0xe9   : > { %2234 = vmatpush1.bf16.msra.mxu0 %v4225_v36  ;;  %v4274_v36 = vld [vmem:[%s5982_s2 + $0xf8] sm:$0xff]  }
  0xea   : > { %2235 = vmatprep.subr.bf16.mxu0 %v4230_v38  ;;  %v4275_v38 = vld [vmem:[%s5982_s2 + $0xb8] sm:$0xff]   ;;  %3855 = vmatprep.subr.bf16.mxu1 %v4274_v36 }
  0xec   : > { %2060 = vmatmul.mubr.bf16.gmra.mxu0 %v4747_v3  ;;  %v4234_v3 = vld [vmem:[%s5981_s1 + $0x5e8] ss:$16 sps:$4 sm:$0xff]  }
  0xed   : > { %2173 = vmatmul.mubr.bf16.gmra.mxu1 %v4749_v4  ;;  %2236 = vmatpush1.bf16.msra.mxu0 %v4228_v49  ;;  %v4239_v4 = vld [vmem:[%s5981_s1 + $0x5cc] ss:$16 sps:$4 sm:$0xff]  }
  0xee   : > { %2069 = vmatprep.mubr.bf16.mxu0 %v4754_v6  ;;  %2237 = vmatprep.subr.bf16.mxu0 %v4233_v50  ;;  %v4237_v6 = vld [vmem:[%s5981_s1 + $0x5c8] ss:$16 sps:$4 sm:$0xff]  }
  0xef   : > { %2182 = vmatprep.mubr.bf16.mxu1 %v4759_v8  ;;  %v4242_v8 = vld [vmem:[%s5981_s1 + $0x5ac] ss:$16 sps:$4 sm:$0xff]  }
  0xf1   : > { %2238 = vmatpush1.bf16.msra.mxu0 %v4231_v52 }
  0xf2   : > { %2239 = vmatprep.subr.bf16.mxu0 %v4236_v56 }
  0xf4   : > { %2070 = vmatmul.mubr.bf16.gmra.mxu0 %v4782_v24  ;;  %v4240_v24 = vld [vmem:[%s5981_s1 + $0x5a8] ss:$16 sps:$4 sm:$0xff]  }
  0xf5   : > { %2183 = vmatmul.mubr.bf16.gmra.mxu1 %v4784_v25  ;;  %2240 = vmatpush2.bf16.msra.mxu0 %v4234_v3  ;;  %v4245_v25 = vld [vmem:[%s5981_s1 + $0x58c] ss:$16 sps:$4 sm:$0xff]  }
  0xf6   : > { %2079 = vmatprep.mubr.bf16.mxu0 %v4789_v27  ;;  %2241 = vmatprep.subr.bf16.mxu0 %v4239_v4  ;;  %v4243_v27 = vld [vmem:[%s5981_s1 + $0x588] ss:$16 sps:$4 sm:$0xff]   ;;  %v4269_v4 = vld [vmem:[%s5982_s2 + $0x10] sm:$0xff]  }
  0xf7   : > { %2192 = vmatprep.mubr.bf16.mxu1 %v4794_v29  ;;  %v4248_v29 = vld [vmem:[%s5981_s1 + $0x56c] ss:$16 sps:$4 sm:$0xff]  }
  0xf9   : > { %2242 = vmatpush2.bf16.msra.mxu0 %v4237_v6 }
  0xfa   : > { %2243 = vmatprep.subr.bf16.mxu0 %v4242_v8 }
  0xfc   : > { %2080 = vmatmul.mubr.bf16.gmra.mxu0 %v4814_v44  ;;  %v4246_v44 = vld [vmem:[%s5981_s1 + $0x568] ss:$16 sps:$4 sm:$0xff]  }
  0xfd   : > { %2193 = vmatmul.mubr.bf16.gmra.mxu1 %v4816_v45  ;;  %2244 = vmatpush2.bf16.msra.mxu0 %v4240_v24  ;;  %v4251_v45 = vld [vmem:[%s5981_s1 + $0x54c] ss:$16 sps:$4 sm:$0xff]  }
  0xfe   : > { %2089 = vmatprep.mubr.bf16.mxu0 %v4821_v47  ;;  %2245 = vmatprep.subr.bf16.mxu0 %v4245_v25  ;;  %v4249_v47 = vld [vmem:[%s5981_s1 + $0x548] ss:$16 sps:$4 sm:$0xff]  }
  0xff   : > { %2202 = vmatprep.mubr.bf16.mxu1 %v4826_v51  ;;  %v4254_v51 = vld [vmem:[%s5981_s1 + $0x52c] ss:$16 sps:$4 sm:$0xff]  }
 0x100   : > { %v4271_v25 = vld [vmem:[%s5982_s2 + $0x8] sm:$0xff]  }
 0x101   : > { %2246 = vmatpush2.bf16.msra.mxu0 %v4243_v27  ;;  %v4272_v27 = vld [vmem:[%s5982_s2 + $0x40] sm:$0xff]  }
 0x102   : > { %2247 = vmatprep.subr.bf16.mxu0 %v4248_v29  ;;  %v4276_v29 = vld [vmem:[%s5982_s2 + $0xf0] sm:$0xff]  }
 0x104   : > { %2090 = vmatmul.mubr.bf16.gmra.mxu0 %v4846_v2  ;;  %v4252_v2 = vld [vmem:[%s5981_s1 + $0x528] ss:$16 sps:$4 sm:$0xff]  }
 0x105   : > { %2203 = vmatmul.mubr.bf16.gmra.mxu1 %v4848_v5  ;;  %2248 = vmatpush2.bf16.msra.mxu0 %v4246_v44  ;;  %v4257_v5 = vld [vmem:[%s5981_s1 + $0x50c] ss:$16 sps:$4 sm:$0xff]   ;;  %v4277_v44 = vld [vmem:[%s5982_s2 + $0xb0] sm:$0xff]  }
 0x106   : > { %2099 = vmatprep.mubr.bf16.mxu0 %v4853_v9  ;;  %2249 = vmatprep.subr.bf16.mxu0 %v4251_v45  ;;  %v4255_v9 = vld [vmem:[%s5981_s1 + $0x508] ss:$16 sps:$4 sm:$0xff]  }
 0x107   : > { %2212 = vmatprep.mubr.bf16.mxu1 %v4858_v11  ;;  %v4258_v11 = vld [vmem:[%s5982_s2 + $0x78] sm:$0xff]  }
 0x109   : > { %2250 = vmatpush2.bf16.msra.mxu0 %v4249_v47 }
 0x10a   : > { %2251 = vmatprep.subr.bf16.mxu0 %v4254_v51 }
 0x10c   : > { %2100 = vmatmul.mubr.bf16.gmra.mxu0 %v4876_v26  ;;  %v4259_v26 = vld [vmem:[%s5982_s2 + $0x38] sm:$0xff]  }
 0x10d   : > { %2213 = vmatmul.mubr.bf16.gmra.mxu1 %v4878_v28  ;;  %2252 = vmatpush2.bf16.msra.mxu0 %v4252_v2  ;;  %v4260_v28 = vld [vmem:[%s5982_s2 + $0x70] sm:$0xff]  }
 0x10e   : > { %2255 = vmatprep.mubr.bf16.mxu0 %v4883_v31  ;;  %2253 = vmatprep.subr.bf16.mxu0 %v4257_v5 }
 0x10f   : > { %2368 = vmatprep.mubr.bf16.mxu1 %v6001_v14 }
 0x111   : > { %2254 = vmatpush2.bf16.msra.mxu0 %v4255_v9  ;;  %v4273_v9 = vld [vmem:[%s5982_s2] sm:$0xff]  }
 0x112   : > { %3791 = vmatprep.subr.bf16.mxu0 %v4258_v11 }
 0x114   : > { %v1579_v37 = vpop.f32.mrf.mxu0  ;;  %2256 = vmatmul.mubr.bf16.vlgmr.msra.gmra.mxu0 %v4908_v55  ;;  %v4262_v55 = vld [vmem:[%s5982_s2 + $0x68] sm:$0xff]  }
 0x115   : > { %v1692_v59 = vpop.f32.mrf.mxu1  ;;  %3538 = vmatmul.mubr.msk.bf16.vlgmr.msra.gmra.mxu1 %vm1520_vm0, %v4910_v57  ;;  %2265 = vmatprep.mubr.bf16.mxu0 %v4923_v63 }
 0x116   : > { %v5362_v31 = vadd.f32 %v1692_v59, %v1579_v37  ;;  %2378 = vmatprep.mubr.bf16.mxu1 %v6001_v14  ;;  %v1581_v60 = vpop.f32.mrf.mxu0  ;;  %3792 = vmatpush3.bf16.msra.mxu0 %v4259_v26  ;;  %v4279_v37 = vld [vmem:[%s5982_s2 + $0xa8] sm:$0xff]  }
 0x117   : > { %v1694_v42 = vpop.f32.mrf.mxu1  ;;  %3793 = vmatprep.subr.bf16.mxu0 %v4260_v28  ;;  %3856 = vmatpush3.bf16.msra.mxu1 %v4275_v38  ;;  %v4278_v28 = vld [vmem:[%s5982_s2 + $0xe8] sm:$0xff]  }
 0x118   : > { %v5369_v12 = vadd.f32 %v1694_v42, %v1581_v60  ;;  %v5374_v57 = vpop.f32.mrf.mxu0  ;;  %3857 = vmatprep.subr.bf16.mxu1 %v4276_v29  ;;  %v6003_v42 = vld [vmem:[#allocation5_spill] sm:$0xff] }
 0x119   : > { %v5376_v41 = vpop.f32.mrf.mxu1 }
 0x11a   : > { %v5378_v63 = vpop.f32.mrf.mxu0  ;;  %3794 = vmatpush3.bf16.msra.mxu0 %v4261_v48  ;;  %v6004_v48 = vld [vmem:[#allocation6_spill] sm:$0xff] }
 0x11b   : > { %v5380_v39 = vpop.f32.mrf.mxu1  ;;  %3795 = vmatprep.subr.bf16.mxu0 %v4262_v55  ;;  %3858 = vmatpush3.bf16.msra.mxu1 %v4277_v44  ;;  %v4282_v44 = vld [vmem:[%s5982_s2 + $0xd8] sm:$0xff]  }
 0x11c   : > { %v1589_v13 = vpop.f32.mrf.mxu0  ;;  %2266 = vmatmul.mubr.bf16.gmra.mxu0 %v4944_v18  ;;  %v4266_v18 = vld [vmem:[%s5982_s2 + $0x58] sm:$0xff]   ;;  %3859 = vmatprep.subr.bf16.mxu1 %v4278_v28 }
 0x11d   : > { %v1702_v1 = vpop.f32.mrf.mxu1  ;;  %3539 = vmatmul.mubr.msk.bf16.gmra.mxu1 %vm1520_vm0, %v4946_v19  ;;  %2275 = vmatprep.mubr.bf16.mxu0 %v4967_v40 }
 0x11e   : > { %v5391_v10 = vadd.f32 %v1702_v1, %v1589_v13  ;;  %2388 = vmatprep.mubr.bf16.mxu1 %v6001_v14  ;;  %v1591_v53 = vpop.f32.mrf.mxu0  ;;  %3796 = vmatpush3.bf16.msra.mxu0 %v4263_v61  ;;  %v6005_v61 = vld [vmem:[#allocation7_spill] sm:$0xff] }
 0x11f   : > { %v1704_v54 = vpop.f32.mrf.mxu1  ;;  %3797 = vmatprep.subr.bf16.mxu0 %v4264_v35  ;;  %3860 = vmatpush3.bf16.msra.mxu1 %v4279_v37 }
 0x120   : > { %v5398_v16 = vadd.f32 %v1704_v54, %v1591_v53  ;;  %v5403_v19 = vpop.f32.mrf.mxu0 }
 0x121   : > { %v5405_v21 = vpop.f32.mrf.mxu1 }
 0x122   : > { %v5407_v40 = vpop.f32.mrf.mxu0  ;;  %3798 = vmatpush3.bf16.msra.mxu0 %v4265_v15 }
 0x123   : > { %v5409_v23 = vpop.f32.mrf.mxu1  ;;  %3799 = vmatprep.subr.bf16.mxu0 %v4266_v18 }
 0x124   : > { %v1599_v49 = vpop.f32.mrf.mxu0  ;;  %2276 = vmatmul.mubr.bf16.gmra.mxu0 %v4990_v62  ;;  %v4270_v62 = vld [vmem:[%s5982_s2 + $0x48] sm:$0xff]  }
 0x125   : > { %v1712_v50 = vpop.f32.mrf.mxu1  ;;  %3540 = vmatmul.mubr.msk.bf16.gmra.mxu1 %vm1520_vm0, %v4992_v0  ;;  %2285 = vmatprep.mubr.bf16.mxu0 %v5008_v17 }
 0x126   : > { %v5426_v52 = vadd.f32 %v1712_v50, %v1599_v49  ;;  %2398 = vmatprep.mubr.bf16.mxu1 %v6001_v14  ;;  %v1601_v56 = vpop.f32.mrf.mxu0  ;;  %3800 = vmatpush3.bf16.msra.mxu0 %v4267_v33  ;;  %v4280_v33 = vld [vmem:[%s5982_s2 + $0xe0] sm:$0xff]   ;;  %v6006_v49 = vld [vmem:[#allocation8_spill] sm:$0xff] }
 0x127   : > { %v1714_v3 = vpop.f32.mrf.mxu1  ;;  %3801 = vmatprep.subr.bf16.mxu0 %v4268_v34  ;;  %v4281_v34 = vld [vmem:[%s5982_s2 + $0xa0] sm:$0xff]   ;;  %3861 = vmatprep.subr.bf16.mxu1 %v4280_v33 }
 0x128   : > { %v5433_v6 = vadd.f32 %v1714_v3, %v1601_v56  ;;  %v5438_v0 = vpop.f32.mrf.mxu0  ;;  %v6007_v56 = vld [vmem:[#allocation9_spill] sm:$0xff]  ;;  %3862 = vmatpush3.bf16.msra.mxu1 %v4281_v34 }
 0x129   : > { %v5440_v17 = vpop.f32.mrf.mxu1  ;;  %3863 = vmatprep.subr.bf16.mxu1 %v4282_v44 }
 0x12a   : > { %v5442_v8 = vpop.f32.mrf.mxu0  ;;  %3802 = vmatpush3.bf16.msra.mxu0 %v4269_v4 }
 0x12b   : > { %v5444_v24 = vpop.f32.mrf.mxu1  ;;  %3803 = vmatprep.subr.bf16.mxu0 %v4270_v62 }
 0x12c   : > { %v1609_v45 = vpop.f32.mrf.mxu0  ;;  %2286 = vmatmul.mubr.bf16.gmra.mxu0 %v5031_v43 }
 0x12d   : > { %v1722_v47 = vpop.f32.mrf.mxu1  ;;  %3541 = vmatmul.mubr.msk.bf16.gmra.mxu1 %vm1520_vm0, %v5033_v46  ;;  %2295 = vmatprep.mubr.bf16.mxu0 %v5049_v7 }
 0x12e   : > { %v5461_v51 = vadd.f32 %v1722_v47, %v1609_v45  ;;  %2408 = vmatprep.mubr.bf16.mxu1 %v6001_v14  ;;  %v1611_v2 = vpop.f32.mrf.mxu0  ;;  %3804 = vmatpush3.bf16.msra.mxu0 %v4271_v25  ;;  %v4283_v45 = vld [vmem:[%s5982_s2 + $0x98] sm:$0xff]  }
 0x12f   : > { %v1724_v5 = vpop.f32.mrf.mxu1  ;;  %3805 = vmatprep.subr.bf16.mxu0 %v4272_v27  ;;  %3864 = vmatpush3.bf16.msra.mxu1 %v4283_v45 }
 0x130   : > { %v5468_v11 = vadd.f32 %v1724_v5, %v1611_v2  ;;  %v5470_v43 = vpop.f32.mrf.mxu0 }
 0x131   : > { %v5472_v46 = vpop.f32.mrf.mxu1 }
 0x132   : > { %v5474_v26 = vpop.f32.mrf.mxu0  ;;  %3806 = vmatpush3.bf16.msra.mxu0 %v4273_v9  ;;  %v6008_v9 = vld [vmem:[#allocation10_spill] sm:$0xff] }
 0x133   : > { %v5476_v7 = vpop.f32.mrf.mxu1 }
 0x134   : > { %v1619_v59 = vpop.f32.mrf.mxu0  ;;  %2296 = vmatmul.mubr.bf16.gmra.mxu0 %v6003_v42 }
 0x135   : > { %v1732_v60 = vpop.f32.mrf.mxu1  ;;  %3542 = vmatmul.mubr.msk.bf16.gmra.mxu1 %vm1520_vm0, %v6004_v48  ;;  %2305 = vmatprep.mubr.bf16.mxu0 %v6005_v61 }
 0x136   : > { %v5487_v55 = vadd.f32 %v1732_v60, %v1619_v59  ;;  %2418 = vmatprep.mubr.bf16.mxu1 %v6001_v14  ;;  %v1621_v35 = vpop.f32.mrf.mxu0 }
 0x137   : > { %v1734_v13 = vpop.f32.mrf.mxu1 }
 0x138   : > { %v5491_v1 = vadd.f32 %v1734_v13, %v1621_v35  ;;  %v5493_v53 = vpop.f32.mrf.mxu0 }
 0x139   : > { %v5495_v54 = vpop.f32.mrf.mxu1 }
 0x13a   : > { %v5497_v15 = vpop.f32.mrf.mxu0 }
 0x13b   : > { %v5499_v18 = vpop.f32.mrf.mxu1 }
 0x13c   : > { %v1629_v36 = vpop.f32.mrf.mxu0  ;;  %2306 = vmatmul.mubr.bf16.gmra.mxu0 %v5113_v32 }
 0x13d   : > { %v1742_v38 = vpop.f32.mrf.mxu1  ;;  %3543 = vmatmul.mubr.msk.bf16.gmra.mxu1 %vm1520_vm0, %v6006_v49  ;;  %2315 = vmatprep.mubr.bf16.mxu0 %v6007_v56 }
 0x13e   : > { %v5510_v50 = vadd.f32 %v1742_v38, %v1629_v36  ;;  %2428 = vmatprep.mubr.bf16.mxu1 %v6001_v14  ;;  %v1631_v3 = vpop.f32.mrf.mxu0 }
 0x13f   : > { %v1744_v4 = vpop.f32.mrf.mxu1 }
 0x140   : > { %v5514_v62 = vadd.f32 %v1744_v4, %v1631_v3  ;;  %v5516_v25 = vpop.f32.mrf.mxu0 }
 0x141   : > { %v5518_v27 = vpop.f32.mrf.mxu1 }
 0x142   : > { %v5520_v32 = vpop.f32.mrf.mxu0 }
 0x143   : > { %v5522_v29 = vpop.f32.mrf.mxu1 }
 0x144   : > { %v1639_v47 = vpop.f32.mrf.mxu0  ;;  %2316 = vmatmul.mubr.bf16.gmra.mxu0 %v5155_v22 }
 0x145   : > { %v1752_v2 = vpop.f32.mrf.mxu1  ;;  %3544 = vmatmul.mubr.msk.bf16.gmra.mxu1 %vm1520_vm0, %v5157_v30  ;;  %2325 = vmatprep.mubr.bf16.mxu0 %v6008_v9  ;;  %v4284_v30 = vld [vmem:[%s5982_s2 + $0xd0] sm:$0xff]   ;;  %v1697_v9 = vadd.f32 %v5376_v41, %v5374_v57  ;;  %v4288_v57 = vld [vmem:[%s5982_s2 + $0xc0] sm:$0xff]  }
 0x146   : > { %v5533_v5 = vadd.f32 %v1752_v2, %v1639_v47  ;;  %2438 = vmatprep.mubr.bf16.mxu1 %v6001_v14  ;;  %v1641_v28 = vpop.f32.mrf.mxu0  ;;  %v4285_v14 = vld [vmem:[%s5982_s2 + $0x90] sm:$0xff]   ;;  %3865 = vmatprep.subr.bf16.mxu1 %v4284_v30 }
 0x147   : > { %v1754_v37 = vpop.f32.mrf.mxu1  ;;  %3866 = vmatpush3.bf16.msra.mxu1 %v4285_v14  ;;  %v1699_v14 = vadd.f32 %v5380_v39, %v5378_v63  ;;  %v4289_v63 = vld [vmem:[%s5982_s2 + $0x80] sm:$0xff]  }
 0x148   : > { %v5537_v59 = vadd.f32 %v1754_v37, %v1641_v28  ;;  %v5539_v60 = vpop.f32.mrf.mxu0 }
 0x149   : > { %v5541_v42 = vpop.f32.mrf.mxu1 }
 0x14a   : > { %v5543_v22 = vpop.f32.mrf.mxu0 }
 0x14b   : > { %v5545_v48 = vpop.f32.mrf.mxu1 }
 0x14c   : > { %v1649_v61 = vpop.f32.mrf.mxu0  ;;  %2326 = vmatmul.mubr.bf16.gmra.mxu0 %v5195_v20  ;;  %v4286_v20 = vld [vmem:[%s5982_s2 + $0xc8] sm:$0xff]  }
 0x14d   : > { %v1762_v35 = vpop.f32.mrf.mxu1  ;;  %3545 = vmatmul.mubr.msk.bf16.gmra.mxu1 %vm1520_vm0, %v5197_v58  ;;  %v4287_v58 = vld [vmem:[%s5982_s2 + $0x88] sm:$0xff]   ;;  %3867 = vmatprep.subr.bf16.mxu1 %v4286_v20 }
 0x14e   : > { %v5556_v13 = vadd.f32 %v1762_v35, %v1649_v61  ;;  %v1651_v33 = vpop.f32.mrf.mxu0  ;;  %3868 = vmatpush3.bf16.msra.mxu1 %v4287_v58 }
 0x14f   : > { %v1764_v34 = vpop.f32.mrf.mxu1  ;;  %3869 = vmatprep.subr.bf16.mxu1 %v4288_v57 }
 0x150   : > { %v5558_v36 = vadd.f32 %v1764_v34, %v1651_v33  ;;  %v5560_v38 = vpop.f32.mrf.mxu0 }
 0x151   : > { %v5562_v49 = vpop.f32.mrf.mxu1 }
 0x152   : > { %v5564_v56 = vpop.f32.mrf.mxu0  ;;  %3870 = vmatpush3.bf16.msra.mxu1 %v4289_v63 }
 0x153   : > { %6009 = vst [vmem:[#allocation5_spill] sm:$0xff] %v5564_v56  ;;  %v5566_v3 = vpop.f32.mrf.mxu1 }
 0x154   : > { %6010 = vst [vmem:[#allocation6_spill] sm:$0xff] %v5566_v3  ;;  %v1805_v4 = vpop.f32.mrf.mxu0 }
 0x155   : > { %v1918_v44 = vpop.f32.mrf.mxu1  ;;  %v1806_v45 = vadd.f32 %v1805_v4, %v5362_v31 }
 0x156   : > { %v1807_v47 = vpop.f32.mrf.mxu0 }
 0x157   : > { %v1920_v2 = vpop.f32.mrf.mxu1  ;;  %v1808_v28 = vadd.f32 %v1807_v47, %v5369_v12  ;;  %v1919_v61 = vadd.f32 %v1918_v44, %v1806_v45  ;;  %v1707_v45 = vadd.f32 %v5405_v21, %v5403_v19 }
 0x158   : > { %v1809_v37 = vpop.f32.mrf.mxu0 }
 0x159   : > { %v1922_v30 = vpop.f32.mrf.mxu1  ;;  %v1810_v35 = vadd.f32 %v1809_v37, %v1697_v9  ;;  %v1921_v3 = vadd.f32 %v1920_v2, %v1808_v28  ;;  %vm2449_vm1 = vcmp.ge.f32.partialorder %v1919_v61, 1.0  ;;  %v1709_v9 = vadd.f32 %v5409_v23, %v5407_v40 }
 0x15a   : > { %v1811_v33 = vpop.f32.mrf.mxu0  ;;  %v1737_v23 = vadd.f32 %v5495_v54, %v5493_v53 }
 0x15b   : > { %v1924_v34 = vpop.f32.mrf.mxu1  ;;  %v1923_v31 = vadd.f32 %v1922_v30, %v1810_v35  ;;  %v1812_v20 = vadd.f32 %v1811_v33, %v1699_v14  ;;  %vm2450_vm4 = vcmp.ge.f32.partialorder %v1921_v3, 1.0  ;;  %v5992_v30 = vmov 1.0|1.0  }
 0x15c   : > { %v1815_v4 = vpop.f32.mrf.mxu0 }
 0x15d   : > { %v1928_v56 = vpop.f32.mrf.mxu1  ;;  %vm2453_vm2 = vcmp.ge.f32.partialorder %v1923_v31, 1.0  ;;  %v1925_v12 = vadd.f32 %v1924_v34, %v1812_v20  ;;  %v1816_v41 = vadd.f32 %v1815_v4, %v5391_v10  ;;  %v1717_v31 = vadd.f32 %v5440_v17, %v5438_v0 }
 0x15e   : > { %vm5587_vm3 = vmpackc.low %vm2453_vm2, %vm2449_vm1  ;;  %v1817_v58 = vpop.f32.mrf.mxu0 }
 0x15f   : > { %v1930_v44 = vpop.f32.mrf.mxu1  ;;  %vm2454_vm5 = vcmp.ge.f32.partialorder %v1925_v12, 1.0  ;;  %v1818_v47 = vadd.f32 %v1817_v58, %v5398_v16  ;;  %v1929_v28 = vadd.f32 %v1928_v56, %v1816_v41  ;;  %v1719_v12 = vadd.f32 %v5444_v24, %v5442_v8 }
 0x160   : > { %vm3642_vm6 = vmpackc.low %vm2454_vm5, %vm2450_vm4  ;;  %v1819_v10 = vpop.f32.mrf.mxu0 }
 0x161   : > { %v1932_v2 = vpop.f32.mrf.mxu1  ;;  %v1820_v37 = vadd.f32 %v1819_v10, %v1707_v45  ;;  %3643 = vmatprep.mubr.msk.bf16.mxu0 %vm3642_vm6, %v5992_v30  ;;  %v1931_v19 = vadd.f32 %v1930_v44, %v1818_v47  ;;  %vm2457_vm7 = vcmp.ge.f32.partialorder %v1929_v28, 1.0 }
 0x162   : > { %v1821_v14 = vpop.f32.mrf.mxu0  ;;  %3645 = vmatmul.mubr.msk.bf16.vlgmr.msra.gmra.mxu0 %vm5587_vm3, %v5992_v30 }
 0x163   : > { %v1934_v61 = vpop.f32.mrf.mxu1  ;;  %v1933_v16 = vadd.f32 %v1932_v2, %v1820_v37  ;;  %v1822_v21 = vadd.f32 %v1821_v14, %v1709_v9  ;;  %vm2458_vm10 = vcmp.ge.f32.partialorder %v1931_v19, 1.0  ;;  %v1727_v2 = vadd.f32 %v5472_v46, %v5470_v43 }
 0x164   : > { %v1825_v3 = vpop.f32.mrf.mxu0  ;;  %v1729_v14 = vadd.f32 %v5476_v7, %v5474_v26 }
 0x165   : > { %v1938_v35 = vpop.f32.mrf.mxu1  ;;  %vm2461_vm8 = vcmp.ge.f32.partialorder %v1933_v16, 1.0  ;;  %v1935_v33 = vadd.f32 %v1934_v61, %v1822_v21  ;;  %v1826_v40 = vadd.f32 %v1825_v3, %v5426_v52 }
 0x166   : > { %vm5601_vm9 = vmpackc.low %vm2461_vm8, %vm2457_vm7  ;;  %v1827_v56 = vpop.f32.mrf.mxu0 }
 0x167   : > { %v1940_v34 = vpop.f32.mrf.mxu1  ;;  %vm2462_vm11 = vcmp.ge.f32.partialorder %v1935_v33, 1.0  ;;  %v1828_v20 = vadd.f32 %v1827_v56, %v5433_v6  ;;  %v1939_v52 = vadd.f32 %v1938_v35, %v1826_v40 }
 0x168   : > { %vm3646_vm12 = vmpackc.low %vm2462_vm11, %vm2458_vm10  ;;  %v1829_v4 = vpop.f32.mrf.mxu0 }
 0x169   : > { %v1942_v57 = vpop.f32.mrf.mxu1  ;;  %v1830_v41 = vadd.f32 %v1829_v4, %v1717_v31  ;;  %3647 = vmatprep.mubr.msk.bf16.mxu0 %vm3646_vm12, %v5992_v30  ;;  %v1941_v0 = vadd.f32 %v1940_v34, %v1828_v20  ;;  %vm2465_vm13 = vcmp.ge.f32.partialorder %v1939_v52, 1.0  ;;  %v1739_v20 = vadd.f32 %v5499_v18, %v5497_v15 }
 0x16a   : > { %v1831_v63 = vpop.f32.mrf.mxu0  ;;  %3649 = vmatmul.mubr.msk.bf16.gmra.mxu0 %vm5601_vm9, %v5992_v30 }
 0x16b   : > { %v1944_v39 = vpop.f32.mrf.mxu1  ;;  %v1943_v17 = vadd.f32 %v1942_v57, %v1830_v41  ;;  %v1832_v58 = vadd.f32 %v1831_v63, %v1719_v12  ;;  %vm2466_vm0 = vcmp.ge.f32.partialorder %v1941_v0, 1.0 }
 0x16c   : > { %v1835_v6 = vpop.f32.mrf.mxu0 }
 0x16d   : > { %v1948_v44 = vpop.f32.mrf.mxu1  ;;  %vm2469_vm14 = vcmp.ge.f32.partialorder %v1943_v17, 1.0  ;;  %v1945_v45 = vadd.f32 %v1944_v39, %v1832_v58  ;;  %v1836_v8 = vadd.f32 %v1835_v6, %v5461_v51  ;;  %v1747_v17 = vadd.f32 %v5518_v27, %v5516_v25 }
 0x16e   : > { %vm5615_vm15 = vmpackc.low %vm2469_vm14, %vm2465_vm13  ;;  %v1837_v47 = vpop.f32.mrf.mxu0 }
 0x16f   : > { %v1950_v10 = vpop.f32.mrf.mxu1  ;;  %vm2470_vm1 = vcmp.ge.f32.partialorder %v1945_v45, 1.0  ;;  %v1838_v9 = vadd.f32 %v1837_v47, %v5468_v11  ;;  %v1949_v51 = vadd.f32 %v1948_v44, %v1836_v8  ;;  %v1749_v45 = vadd.f32 %v5522_v29, %v5520_v32 }
 0x170   : > { %vm3650_vm2 = vmpackc.low %vm2470_vm1, %vm2466_vm0  ;;  %v1839_v28 = vpop.f32.mrf.mxu0 }
 0x171   : > { %v1952_v37 = vpop.f32.mrf.mxu1  ;;  %v1840_v61 = vadd.f32 %v1839_v28, %v1727_v2  ;;  %3651 = vmatprep.mubr.msk.bf16.mxu0 %vm3650_vm2, %v5992_v30  ;;  %v1951_v43 = vadd.f32 %v1950_v10, %v1838_v9  ;;  %vm2473_vm3 = vcmp.ge.f32.partialorder %v1949_v51, 1.0 }
 0x172   : > { %v1841_v19 = vpop.f32.mrf.mxu0  ;;  %3653 = vmatmul.mubr.msk.bf16.gmra.mxu0 %vm5615_vm15, %v5992_v30 }
 0x173   : > { %v1954_v16 = vpop.f32.mrf.mxu1  ;;  %v1953_v46 = vadd.f32 %v1952_v37, %v1840_v61  ;;  %v1842_v21 = vadd.f32 %v1841_v19, %v1729_v14  ;;  %vm2474_vm6 = vcmp.ge.f32.partialorder %v1951_v43, 1.0  ;;  %v1757_v14 = vadd.f32 %v5541_v42, %v5539_v60 }
 0x174   : > { %v1845_v11 = vpop.f32.mrf.mxu0 }
 0x175   : > { %v1958_v3 = vpop.f32.mrf.mxu1  ;;  %vm2477_vm4 = vcmp.ge.f32.partialorder %v1953_v46, 1.0  ;;  %v1955_v35 = vadd.f32 %v1954_v16, %v1842_v21  ;;  %v1846_v26 = vadd.f32 %v1845_v11, %v5487_v55  ;;  %v1759_v16 = vadd.f32 %v5545_v48, %v5543_v22 }
 0x176   : > { %vm5629_vm5 = vmpackc.low %vm2477_vm4, %vm2473_vm3  ;;  %v1847_v33 = vpop.f32.mrf.mxu0 }
 0x177   : > { %v1960_v40 = vpop.f32.mrf.mxu1  ;;  %vm2478_vm7 = vcmp.ge.f32.partialorder %v1955_v35, 1.0  ;;  %v1848_v56 = vadd.f32 %v1847_v33, %v5491_v1  ;;  %v1959_v55 = vadd.f32 %v1958_v3, %v1846_v26  ;;  %v1767_v33 = vadd.f32 %v5562_v49, %v5560_v38 }
 0x178   : > { %vm3654_vm8 = vmpackc.low %vm2478_vm7, %vm2474_vm6  ;;  %v1849_v34 = vpop.f32.mrf.mxu0 }
 0x179   : > { %v1962_v31 = vpop.f32.mrf.mxu1  ;;  %v1850_v4 = vadd.f32 %v1849_v34, %v1737_v23  ;;  %3655 = vmatprep.mubr.msk.bf16.mxu0 %vm3654_vm8, %v5992_v30  ;;  %v1961_v53 = vadd.f32 %v1960_v40, %v1848_v56  ;;  %vm2481_vm9 = vcmp.ge.f32.partialorder %v1959_v55, 1.0  ;;  %v6025_v34 = vld [vmem:[#allocation5_spill] sm:$0xff] }
 0x17a   : > { %v1851_v57 = vpop.f32.mrf.mxu0  ;;  %3657 = vmatmul.mubr.msk.bf16.gmra.mxu0 %vm5629_vm5, %v5992_v30 }
 0x17b   : > { %v1964_v12 = vpop.f32.mrf.mxu1  ;;  %v1963_v54 = vadd.f32 %v1962_v31, %v1850_v4  ;;  %v1852_v52 = vadd.f32 %v1851_v57, %v1739_v20  ;;  %vm2482_vm12 = vcmp.ge.f32.partialorder %v1961_v53, 1.0  ;;  %v6026_v31 = vld [vmem:[#allocation6_spill] sm:$0xff] }
 0x17c   : > { %v1855_v1 = vpop.f32.mrf.mxu0  ;;  %v1769_v20 = vadd.f32 %v6026_v31, %v6025_v34 }
 0x17d   : > { %v1968_v41 = vpop.f32.mrf.mxu1  ;;  %vm2485_vm10 = vcmp.ge.f32.partialorder %v1963_v54, 1.0  ;;  %v1965_v63 = vadd.f32 %v1964_v12, %v1852_v52  ;;  %v1856_v15 = vadd.f32 %v1855_v1, %v5510_v50 }
 0x17e   : > { %vm5643_vm11 = vmpackc.low %vm2485_vm10, %vm2481_vm9  ;;  %v1857_v39 = vpop.f32.mrf.mxu0 }
 0x17f   : > { %v1970_v0 = vpop.f32.mrf.mxu1  ;;  %vm2486_vm13 = vcmp.ge.f32.partialorder %v1965_v63, 1.0  ;;  %v1858_v58 = vadd.f32 %v1857_v39, %v5514_v62  ;;  %v1969_v50 = vadd.f32 %v1968_v41, %v1856_v15 }
 0x180   : > { %vm3658_vm14 = vmpackc.low %vm2486_vm13, %vm2482_vm12  ;;  %v1859_v6 = vpop.f32.mrf.mxu0 }
 0x181   : > { %v1972_v44 = vpop.f32.mrf.mxu1  ;;  %v1860_v8 = vadd.f32 %v1859_v6, %v1747_v17  ;;  %3659 = vmatprep.mubr.msk.bf16.mxu0 %vm3658_vm14, %v5992_v30  ;;  %v1971_v25 = vadd.f32 %v1970_v0, %v1858_v58  ;;  %vm2489_vm15 = vcmp.ge.f32.partialorder %v1969_v50, 1.0 }
 0x182   : > { %v1861_v24 = vpop.f32.mrf.mxu0  ;;  %3661 = vmatmul.mubr.msk.bf16.gmra.mxu0 %vm5643_vm11, %v5992_v30 }
 0x183   : > { %v1974_v47 = vpop.f32.mrf.mxu1  ;;  %v1973_v27 = vadd.f32 %v1972_v44, %v1860_v8  ;;  %v1862_v10 = vadd.f32 %v1861_v24, %v1749_v45  ;;  %vm2490_vm2 = vcmp.ge.f32.partialorder %v1971_v25, 1.0 }
 0x184   : > { %v1865_v62 = vpop.f32.mrf.mxu0 }
 0x185   : > { %v1978_v2 = vpop.f32.mrf.mxu1  ;;  %vm2493_vm0 = vcmp.ge.f32.partialorder %v1973_v27, 1.0  ;;  %v1975_v9 = vadd.f32 %v1974_v47, %v1862_v10  ;;  %v1866_v32 = vadd.f32 %v1865_v62, %v5533_v5 }
 0x186   : > { %vm5657_vm1 = vmpackc.low %vm2493_vm0, %vm2489_vm15  ;;  %v1867_v28 = vpop.f32.mrf.mxu0 }
 0x187   : > { %v1980_v37 = vpop.f32.mrf.mxu1  ;;  %vm2494_vm3 = vcmp.ge.f32.partialorder %v1975_v9, 1.0  ;;  %v1868_v51 = vadd.f32 %v1867_v28, %v5537_v59  ;;  %v1979_v5 = vadd.f32 %v1978_v2, %v1866_v32 }
 0x188   : > { %vm3662_vm4 = vmpackc.low %vm2494_vm3, %vm2490_vm2  ;;  %v1869_v61 = vpop.f32.mrf.mxu0 }
 0x189   : > { %v1982_v19 = vpop.f32.mrf.mxu1  ;;  %v1870_v43 = vadd.f32 %v1869_v61, %v1757_v14  ;;  %3663 = vmatprep.mubr.msk.bf16.mxu0 %vm3662_vm4, %v5992_v30  ;;  %v1981_v60 = vadd.f32 %v1980_v37, %v1868_v51  ;;  %vm2497_vm5 = vcmp.ge.f32.partialorder %v1979_v5, 1.0 }
 0x18a   : > { %v1871_v46 = vpop.f32.mrf.mxu0  ;;  %3665 = vmatmul.mubr.msk.bf16.gmra.mxu0 %vm5657_vm1, %v5992_v30 }
 0x18b   : > { %v1984_v21 = vpop.f32.mrf.mxu1  ;;  %v1983_v42 = vadd.f32 %v1982_v19, %v1870_v43  ;;  %v1872_v11 = vadd.f32 %v1871_v46, %v1759_v16  ;;  %vm2498_vm8 = vcmp.ge.f32.partialorder %v1981_v60, 1.0 }
 0x18c   : > { %v1875_v59 = vpop.f32.mrf.mxu0 }
 0x18d   : > { %v1988_v3 = vpop.f32.mrf.mxu1  ;;  %vm2501_vm6 = vcmp.ge.f32.partialorder %v1983_v42, 1.0  ;;  %v1985_v35 = vadd.f32 %v1984_v21, %v1872_v11  ;;  %v1876_v22 = vadd.f32 %v1875_v59, %v5556_v13 }
 0x18e   : > { %vm5671_vm7 = vmpackc.low %vm2501_vm6, %vm2497_vm5  ;;  %v1877_v26 = vpop.f32.mrf.mxu0 }
 0x18f   : > { %v1990_v7 = vpop.f32.mrf.mxu1  ;;  %vm2502_vm9 = vcmp.ge.f32.partialorder %v1985_v35, 1.0  ;;  %v1878_v40 = vadd.f32 %v1877_v26, %v5558_v36  ;;  %v1989_v13 = vadd.f32 %v1988_v3, %v1876_v22 }
 0x190   : > { %vm3666_vm10 = vmpackc.low %vm2502_vm9, %vm2498_vm8  ;;  %v1879_v23 = vpop.f32.mrf.mxu0 }
 0x191   : > { %v1992_v56 = vpop.f32.mrf.mxu1  ;;  %v1880_v55 = vadd.f32 %v1879_v23, %v1767_v33  ;;  %3667 = vmatprep.mubr.msk.bf16.mxu0 %vm3666_vm10, %v5992_v30  ;;  %v1991_v38 = vadd.f32 %v1990_v7, %v1878_v40  ;;  %vm2505_vm11 = vcmp.ge.f32.partialorder %v1989_v13, 1.0 }
 0x192   : > { %v1881_v4 = vpop.f32.mrf.mxu0  ;;  %3669 = vmatmul.mubr.msk.bf16.gmra.mxu0 %vm5671_vm7, %v5992_v30 }
 0x193   : > { %v1994_v57 = vpop.f32.mrf.mxu1  ;;  %v1993_v49 = vadd.f32 %v1992_v56, %v1880_v55  ;;  %v1882_v12 = vadd.f32 %v1881_v4, %v1769_v20  ;;  %vm2506_vm14 = vcmp.ge.f32.partialorder %v1991_v38, 1.0 }
 0x194   : > { %v2031_v36 = vpop.f32.mrf.mxu0 }
 0x195   : > { %v2144_v53 = vpop.f32.mrf.mxu1  ;;  %vm2509_vm12 = vcmp.ge.f32.partialorder %v1993_v49, 1.0  ;;  %v1995_v54 = vadd.f32 %v1994_v57, %v1882_v12 }
 0x196   : > { %v5684_v52 = vadd.f32 %v2144_v53, %v2031_v36  ;;  %vm3672_vm13 = vmpackc.low %vm2509_vm12, %vm2505_vm11  ;;  %v2033_v1 = vpop.f32.mrf.mxu0 }
 0x197   : > { %v2146_v41 = vpop.f32.mrf.mxu1  ;;  %vm2510_vm15 = vcmp.ge.f32.partialorder %v1995_v54, 1.0 }
 0x198   : > { %v5686_v63 = vadd.f32 %v2146_v41, %v2033_v1  ;;  %vm3670_vm0 = vmpackc.low %vm2510_vm15, %vm2506_vm14  ;;  %v5688_v15 = vpop.f32.mrf.mxu0 }
 0x199   : > { %v5690_v18 = vpop.f32.mrf.mxu1  ;;  %3671 = vmatprep.mubr.msk.bf16.mxu0 %vm3670_vm0, %v5992_v30 }
 0x19a   : > { %v5693_v39 = vpop.f32.mrf.mxu0  ;;  %3673 = vmatmul.mubr.msk.bf16.gmra.mxu0 %vm3672_vm13, %v5992_v30 }
 0x19b   : > { %v5695_v0 = vpop.f32.mrf.mxu1 }
 0x19c   : > { %v2041_v17 = vpop.f32.mrf.mxu0 }
 0x19d   : > { %v2154_v58 = vpop.f32.mrf.mxu1 }
 0x19e   : > { %v5698_v6 = vadd.f32 %v2154_v58, %v2041_v17  ;;  %v2043_v44 = vpop.f32.mrf.mxu0 }
 0x19f   : > { %v2156_v45 = vpop.f32.mrf.mxu1 }
 0x1a0   : > { %v5700_v50 = vadd.f32 %v2156_v45, %v2043_v44  ;;  %v5702_v8 = vpop.f32.mrf.mxu0 }
 0x1a1   : > { %v5704_v24 = vpop.f32.mrf.mxu1 }
 0x1a2   : > { %v5706_v47 = vpop.f32.mrf.mxu0 }
 0x1a3   : > { %v5708_v25 = vpop.f32.mrf.mxu1 }
 0x1a4   : > { %v2051_v27 = vpop.f32.mrf.mxu0 }
 0x1a5   : > { %v2164_v10 = vpop.f32.mrf.mxu1 }
 0x1a6   : > { %v5710_v62 = vadd.f32 %v2164_v10, %v2051_v27  ;;  %v2053_v2 = vpop.f32.mrf.mxu0 }
 0x1a7   : > { %v2166_v9 = vpop.f32.mrf.mxu1 }
 0x1a8   : > { %v5712_v32 = vadd.f32 %v2166_v9, %v2053_v2  ;;  %v5714_v29 = vpop.f32.mrf.mxu0 }
 0x1a9   : > { %v5716_v28 = vpop.f32.mrf.mxu1 }
 0x1aa   : > { %v5718_v37 = vpop.f32.mrf.mxu0 }
 0x1ab   : > { %v5720_v14 = vpop.f32.mrf.mxu1 }
 0x1ac   : > { %v2061_v51 = vpop.f32.mrf.mxu0 }
 0x1ad   : > { %v2174_v61 = vpop.f32.mrf.mxu1 }
 0x1ae   : > { %v5722_v19 = vadd.f32 %v2174_v61, %v2061_v51  ;;  %v2063_v16 = vpop.f32.mrf.mxu0 }
 0x1af   : > { %v2176_v5 = vpop.f32.mrf.mxu1 }
 0x1b0   : > { %v5724_v43 = vadd.f32 %v2176_v5, %v2063_v16  ;;  %v5726_v46 = vpop.f32.mrf.mxu0 }
 0x1b1   : > { %v5728_v21 = vpop.f32.mrf.mxu1 }
 0x1b2   : > { %v5730_v60 = vpop.f32.mrf.mxu0 }
 0x1b3   : > { %v5732_v42 = vpop.f32.mrf.mxu1 }
 0x1b4   : > { %v2071_v11 = vpop.f32.mrf.mxu0 }
 0x1b5   : > { %v2184_v59 = vpop.f32.mrf.mxu1 }
 0x1b6   : > { %v5734_v3 = vadd.f32 %v2184_v59, %v2071_v11  ;;  %v2073_v35 = vpop.f32.mrf.mxu0 }
 0x1b7   : > { %v2186_v22 = vpop.f32.mrf.mxu1 }
 0x1b8   : > { %v5736_v48 = vadd.f32 %v2186_v22, %v2073_v35  ;;  %v5738_v26 = vpop.f32.mrf.mxu0 }
 0x1b9   : > { %v5740_v7 = vpop.f32.mrf.mxu1 }
 0x1ba   : > { %v5742_v33 = vpop.f32.mrf.mxu0 }
 0x1bb   : > { %v5744_v40 = vpop.f32.mrf.mxu1 }
 0x1bc   : > { %v2081_v23 = vpop.f32.mrf.mxu0 }
 0x1bd   : > { %v2194_v56 = vpop.f32.mrf.mxu1 }
 0x1be   : > { %v5746_v34 = vadd.f32 %v2194_v56, %v2081_v23  ;;  %v2083_v31 = vpop.f32.mrf.mxu0 }
 0x1bf   : > { %v2196_v20 = vpop.f32.mrf.mxu1 }
 0x1c0   : > { %v5748_v13 = vadd.f32 %v2196_v20, %v2083_v31  ;;  %v5750_v55 = vpop.f32.mrf.mxu0  ;;  %v2149_v31 = vadd.f32 %v5690_v18, %v5688_v15 }
 0x1c1   : > { %v5752_v4 = vpop.f32.mrf.mxu1 }
 0x1c2   : > { %v5754_v57 = vpop.f32.mrf.mxu0 }
 0x1c3   : > { %v5756_v38 = vpop.f32.mrf.mxu1 }
 0x1c4   : > { %v2091_v49 = vpop.f32.mrf.mxu0 }
 0x1c5   : > { %v2204_v12 = vpop.f32.mrf.mxu1 }
 0x1c6   : > { %v5758_v36 = vadd.f32 %v2204_v12, %v2091_v49  ;;  %v2093_v53 = vpop.f32.mrf.mxu0 }
 0x1c7   : > { %v2206_v54 = vpop.f32.mrf.mxu1 }
 0x1c8   : > { %v5760_v1 = vadd.f32 %v2206_v54, %v2093_v53  ;;  %v5762_v41 = vpop.f32.mrf.mxu0  ;;  %v2151_v53 = vadd.f32 %v5695_v0, %v5693_v39  ;;  %v2159_v0 = vadd.f32 %v5704_v24, %v5702_v8 }
 0x1c9   : > { %v5764_v17 = vpop.f32.mrf.mxu1 }
 0x1ca   : > { %v5766_v58 = vpop.f32.mrf.mxu0 }
 0x1cb   : > { %v5768_v44 = vpop.f32.mrf.mxu1 }
 0x1cc   : > { %v2101_v45 = vpop.f32.mrf.mxu0 }
 0x1cd   : > { %v2214_v27 = vpop.f32.mrf.mxu1 }
 0x1ce   : > { %v5770_v10 = vadd.f32 %v2214_v27, %v2101_v45  ;;  %v2103_v2 = vpop.f32.mrf.mxu0 }
 0x1cf   : > { %v2216_v9 = vpop.f32.mrf.mxu1 }
 0x1d0   : > { %v5772_v51 = vadd.f32 %v2216_v9, %v2103_v2  ;;  %v5774_v61 = vpop.f32.mrf.mxu0 }
 0x1d1   : > { %v5776_v16 = vpop.f32.mrf.mxu1 }
 0x1d2   : > { %v5778_v5 = vpop.f32.mrf.mxu0 }
 0x1d3   : > { %6027 = vst [vmem:[#allocation7_spill] sm:$0xff] %v5778_v5  ;;  %v5780_v11 = vpop.f32.mrf.mxu1 }
 0x1d4   : > { %6028 = vst [vmem:[#allocation8_spill] sm:$0xff] %v5780_v11  ;;  %v2257_v59 = vpop.f32.mrf.mxu0 }
 0x1d5   : > { %v2370_v35 = vpop.f32.mrf.mxu1  ;;  %v2258_v22 = vadd.f32 %v2257_v59, %v5684_v52 }
 0x1d6   : > { %v2259_v23 = vpop.f32.mrf.mxu0 }
 0x1d7   : > { %v2372_v56 = vpop.f32.mrf.mxu1  ;;  %v2260_v20 = vadd.f32 %v2259_v23, %v5686_v63  ;;  %v2371_v54 = vadd.f32 %v2370_v35, %v2258_v22 }
 0x1d8   : > { %v2261_v49 = vpop.f32.mrf.mxu0 }
 0x1d9   : > { %v2374_v12 = vpop.f32.mrf.mxu1  ;;  %v2262_v45 = vadd.f32 %v2261_v49, %v2149_v31  ;;  %v2373_v9 = vadd.f32 %v2372_v56, %v2260_v20  ;;  %vm2451_vm1 = vcmp.ge.f32.partialorder %v2371_v54, 1.0  ;;  %v6031_v56 = vmov 1.0|1.0  }
 0x1da   : > { %v2263_v27 = vpop.f32.mrf.mxu0 }
 0x1db   : > { %v2376_v2 = vpop.f32.mrf.mxu1  ;;  %v2375_v30 = vadd.f32 %v2374_v12, %v2262_v45  ;;  %v2264_v11 = vadd.f32 %v2263_v27, %v2151_v53  ;;  %vm2452_vm4 = vcmp.ge.f32.partialorder %v2373_v9, 1.0  ;;  %v2169_v45 = vadd.f32 %v5716_v28, %v5714_v29 }
 0x1dc   : > { %v2267_v52 = vpop.f32.mrf.mxu0 }
 0x1dd   : > { %v2380_v59 = vpop.f32.mrf.mxu1  ;;  %vm2455_vm2 = vcmp.ge.f32.partialorder %v2375_v30, 1.0  ;;  %v2377_v5 = vadd.f32 %v2376_v2, %v2264_v11  ;;  %v2268_v15 = vadd.f32 %v2267_v52, %v5698_v6  ;;  %v2161_v30 = vadd.f32 %v5708_v25, %v5706_v47 }
 0x1de   : > { %vm5789_vm3 = vmpackc.low %vm2455_vm2, %vm2451_vm1  ;;  %v2269_v18 = vpop.f32.mrf.mxu0  ;;  %v2171_v52 = vadd.f32 %v5720_v14, %v5718_v37  ;;  %v2189_v25 = vadd.f32 %v5740_v7, %v5738_v26 }
 0x1df   : > { %v2382_v39 = vpop.f32.mrf.mxu1  ;;  %vm2456_vm5 = vcmp.ge.f32.partialorder %v2377_v5, 1.0  ;;  %v2270_v35 = vadd.f32 %v2269_v18, %v5700_v50  ;;  %v2381_v6 = vadd.f32 %v2380_v59, %v2268_v15 }
 0x1e0   : > { %vm3674_vm6 = vmpackc.low %vm2456_vm5, %vm2452_vm4  ;;  %v2271_v22 = vpop.f32.mrf.mxu0 }
 0x1e1   : > { %v2384_v23 = vpop.f32.mrf.mxu1  ;;  %v2272_v11 = vadd.f32 %v2271_v22, %v2159_v0  ;;  %3675 = vmatprep.mubr.msk.bf16.mxu1 %vm3674_vm6, %v6031_v56  ;;  %v2383_v8 = vadd.f32 %v2382_v39, %v2270_v35  ;;  %vm2459_vm7 = vcmp.ge.f32.partialorder %v2381_v6, 1.0 }
 0x1e2   : > { %v2273_v31 = vpop.f32.mrf.mxu0  ;;  %3677 = vmatmul.mubr.msk.bf16.vlgmr.msra.gmra.mxu1 %vm5789_vm3, %v6031_v56 }
 0x1e3   : > { %v2386_v20 = vpop.f32.mrf.mxu1  ;;  %v2385_v24 = vadd.f32 %v2384_v23, %v2272_v11  ;;  %v2274_v5 = vadd.f32 %v2273_v31, %v2161_v30  ;;  %vm2460_vm10 = vcmp.ge.f32.partialorder %v2383_v8, 1.0  ;;  %v2179_v23 = vadd.f32 %v5728_v21, %v5726_v46 }
 0x1e4   : > { %v2277_v50 = vpop.f32.mrf.mxu0  ;;  %v2181_v31 = vadd.f32 %v5732_v42, %v5730_v60  ;;  %v2219_v42 = vadd.f32 %v5776_v16, %v5774_v61 }
 0x1e5   : > { %v2390_v49 = vpop.f32.mrf.mxu1  ;;  %vm2463_vm8 = vcmp.ge.f32.partialorder %v2385_v24, 1.0  ;;  %v2387_v12 = vadd.f32 %v2386_v20, %v2274_v5  ;;  %v2278_v47 = vadd.f32 %v2277_v50, %v5710_v62 }
 0x1e6   : > { %vm5803_vm9 = vmpackc.low %vm2463_vm8, %vm2459_vm7  ;;  %v2279_v53 = vpop.f32.mrf.mxu0 }
 0x1e7   : > { %v2392_v54 = vpop.f32.mrf.mxu1  ;;  %vm2464_vm11 = vcmp.ge.f32.partialorder %v2387_v12, 1.0  ;;  %v2280_v27 = vadd.f32 %v2279_v53, %v5712_v32  ;;  %v2391_v62 = vadd.f32 %v2390_v49, %v2278_v47 }
 0x1e8   : > { %vm3678_vm12 = vmpackc.low %vm2464_vm11, %vm2460_vm10  ;;  %v2281_v2 = vpop.f32.mrf.mxu0 }
 0x1e9   : > { %v2394_v9 = vpop.f32.mrf.mxu1  ;;  %v2282_v59 = vadd.f32 %v2281_v2, %v2169_v45  ;;  %3679 = vmatprep.mubr.msk.bf16.mxu1 %vm3678_vm12, %v6031_v56  ;;  %v2393_v29 = vadd.f32 %v2392_v54, %v2280_v27  ;;  %vm2467_vm13 = vcmp.ge.f32.partialorder %v2391_v62, 1.0  ;;  %v2191_v27 = vadd.f32 %v5744_v40, %v5742_v33 }
 0x1ea   : > { %v2283_v15 = vpop.f32.mrf.mxu0  ;;  %3681 = vmatmul.mubr.msk.bf16.gmra.mxu1 %vm5803_vm9, %v6031_v56 }
 0x1eb   : > { %v2396_v63 = vpop.f32.mrf.mxu1  ;;  %v2395_v28 = vadd.f32 %v2394_v9, %v2282_v59  ;;  %v2284_v18 = vadd.f32 %v2283_v15, %v2171_v52  ;;  %vm2468_vm0 = vcmp.ge.f32.partialorder %v2393_v29, 1.0 }
 0x1ec   : > { %v2287_v32 = vpop.f32.mrf.mxu0 }
 0x1ed   : > { %v2400_v39 = vpop.f32.mrf.mxu1  ;;  %vm2471_vm14 = vcmp.ge.f32.partialorder %v2395_v28, 1.0  ;;  %v2397_v0 = vadd.f32 %v2396_v63, %v2284_v18  ;;  %v2288_v37 = vadd.f32 %v2287_v32, %v5722_v19  ;;  %v2199_v28 = vadd.f32 %v5752_v4, %v5750_v55 }
 0x1ee   : > { %vm5817_vm15 = vmpackc.low %vm2471_vm14, %vm2467_vm13  ;;  %v2289_v35 = vpop.f32.mrf.mxu0 }
 0x1ef   : > { %v2402_v22 = vpop.f32.mrf.mxu1  ;;  %vm2472_vm1 = vcmp.ge.f32.partialorder %v2397_v0, 1.0  ;;  %v2290_v30 = vadd.f32 %v2289_v35, %v5724_v43  ;;  %v2401_v19 = vadd.f32 %v2400_v39, %v2288_v37  ;;  %v2201_v0 = vadd.f32 %v5756_v38, %v5754_v57 }
 0x1f0   : > { %vm3682_vm2 = vmpackc.low %vm2472_vm1, %vm2468_vm0  ;;  %v2291_v6 = vpop.f32.mrf.mxu0 }
 0x1f1   : > { %v2404_v11 = vpop.f32.mrf.mxu1  ;;  %v2292_v20 = vadd.f32 %v2291_v6, %v2179_v23  ;;  %3683 = vmatprep.mubr.msk.bf16.mxu1 %vm3682_vm2, %v6031_v56  ;;  %v2403_v46 = vadd.f32 %v2402_v22, %v2290_v30  ;;  %vm2475_vm3 = vcmp.ge.f32.partialorder %v2401_v19, 1.0 }
 0x1f2   : > { %v2293_v8 = vpop.f32.mrf.mxu0  ;;  %3685 = vmatmul.mubr.msk.bf16.gmra.mxu1 %vm5817_vm15, %v6031_v56 }
 0x1f3   : > { %v2406_v24 = vpop.f32.mrf.mxu1  ;;  %v2405_v21 = vadd.f32 %v2404_v11, %v2292_v20  ;;  %v2294_v5 = vadd.f32 %v2293_v8, %v2181_v31  ;;  %vm2476_vm6 = vcmp.ge.f32.partialorder %v2403_v46, 1.0  ;;  %v2209_v31 = vadd.f32 %v5764_v17, %v5762_v41 }
 0x1f4   : > { %v2297_v43 = vpop.f32.mrf.mxu0 }
 0x1f5   : > { %v2410_v50 = vpop.f32.mrf.mxu1  ;;  %vm2479_vm4 = vcmp.ge.f32.partialorder %v2405_v21, 1.0  ;;  %v2407_v49 = vadd.f32 %v2406_v24, %v2294_v5  ;;  %v2298_v60 = vadd.f32 %v2297_v43, %v5734_v3  ;;  %v2211_v24 = vadd.f32 %v5768_v44, %v5766_v58 }
 0x1f6   : > { %vm5831_vm5 = vmpackc.low %vm2479_vm4, %vm2475_vm3  ;;  %v2299_v12 = vpop.f32.mrf.mxu0 }
 0x1f7   : > { %v2412_v47 = vpop.f32.mrf.mxu1  ;;  %vm2480_vm7 = vcmp.ge.f32.partialorder %v2407_v49, 1.0  ;;  %v2300_v53 = vadd.f32 %v2299_v12, %v5736_v48  ;;  %v2411_v3 = vadd.f32 %v2410_v50, %v2298_v60 }
 0x1f8   : > { %vm3686_vm8 = vmpackc.low %vm2480_vm7, %vm2476_vm6  ;;  %v2301_v54 = vpop.f32.mrf.mxu0 }
 0x1f9   : > { %v2414_v45 = vpop.f32.mrf.mxu1  ;;  %v2302_v2 = vadd.f32 %v2301_v54, %v2189_v25  ;;  %3687 = vmatprep.mubr.msk.bf16.mxu1 %vm3686_vm8, %v6031_v56  ;;  %v2413_v26 = vadd.f32 %v2412_v47, %v2300_v53  ;;  %vm2483_vm9 = vcmp.ge.f32.partialorder %v2411_v3, 1.0  ;;  %v6042_v53 = vld [vmem:[#allocation7_spill] sm:$0xff]  ;;  %v6043_v54 = vld [vmem:[#allocation8_spill] sm:$0xff] }
 0x1fa   : > { %v2303_v9 = vpop.f32.mrf.mxu0  ;;  %3689 = vmatmul.mubr.msk.bf16.gmra.mxu1 %vm5831_vm5, %v6031_v56 }
 0x1fb   : > { %v2416_v52 = vpop.f32.mrf.mxu1  ;;  %v2415_v7 = vadd.f32 %v2414_v45, %v2302_v2  ;;  %v2304_v62 = vadd.f32 %v2303_v9, %v2191_v27  ;;  %vm2484_vm12 = vcmp.ge.f32.partialorder %v2413_v26, 1.0  ;;  %v2221_v45 = vadd.f32 %v6043_v54, %v6042_v53 }
 0x1fc   : > { %v2307_v48 = vpop.f32.mrf.mxu0 }
 0x1fd   : > { %v2420_v59 = vpop.f32.mrf.mxu1  ;;  %vm2487_vm10 = vcmp.ge.f32.partialorder %v2415_v7, 1.0  ;;  %v2417_v15 = vadd.f32 %v2416_v52, %v2304_v62  ;;  %v2308_v33 = vadd.f32 %v2307_v48, %v5746_v34 }
 0x1fe   : > { %vm5845_vm11 = vmpackc.low %vm2487_vm10, %vm2483_vm9  ;;  %v2309_v63 = vpop.f32.mrf.mxu0 }
 0x1ff   : > { %v2422_v29 = vpop.f32.mrf.mxu1  ;;  %vm2488_vm13 = vcmp.ge.f32.partialorder %v2417_v15, 1.0  ;;  %v2310_v18 = vadd.f32 %v2309_v63, %v5748_v13  ;;  %v2421_v34 = vadd.f32 %v2420_v59, %v2308_v33 }
 0x200   : > { %vm3690_vm14 = vmpackc.low %vm2488_vm13, %vm2484_vm12  ;;  %v2311_v32 = vpop.f32.mrf.mxu0 }
 0x201   : > { %v2424_v39 = vpop.f32.mrf.mxu1  ;;  %v2312_v37 = vadd.f32 %v2311_v32, %v2199_v28  ;;  %3691 = vmatprep.mubr.msk.bf16.mxu1 %vm3690_vm14, %v6031_v56  ;;  %v2423_v55 = vadd.f32 %v2422_v29, %v2310_v18  ;;  %vm2491_vm15 = vcmp.ge.f32.partialorder %v2421_v34, 1.0 }
 0x202   : > { %v2313_v14 = vpop.f32.mrf.mxu0  ;;  %3693 = vmatmul.mubr.msk.bf16.gmra.mxu1 %vm5845_vm11, %v6031_v56 }
 0x203   : > { %v2426_v35 = vpop.f32.mrf.mxu1  ;;  %v2425_v4 = vadd.f32 %v2424_v39, %v2312_v37  ;;  %v2314_v22 = vadd.f32 %v2313_v14, %v2201_v0  ;;  %vm2492_vm2 = vcmp.ge.f32.partialorder %v2423_v55, 1.0 }
 0x204   : > { %v2317_v13 = vpop.f32.mrf.mxu0 }
 0x205   : > { %v2430_v23 = vpop.f32.mrf.mxu1  ;;  %vm2495_vm0 = vcmp.ge.f32.partialorder %v2425_v4, 1.0  ;;  %v2427_v30 = vadd.f32 %v2426_v35, %v2314_v22  ;;  %v2318_v57 = vadd.f32 %v2317_v13, %v5758_v36 }
 0x206   : > { %vm5859_vm1 = vmpackc.low %vm2495_vm0, %vm2491_vm15  ;;  %v2319_v6 = vpop.f32.mrf.mxu0 }
 0x207   : > { %v2432_v11 = vpop.f32.mrf.mxu1  ;;  %vm2496_vm3 = vcmp.ge.f32.partialorder %v2427_v30, 1.0  ;;  %v2320_v19 = vadd.f32 %v2319_v6, %v5760_v1  ;;  %v2431_v36 = vadd.f32 %v2430_v23, %v2318_v57 }
 0x208   : > { %vm3694_vm4 = vmpackc.low %vm2496_vm3, %vm2492_vm2  ;;  %v2321_v20 = vpop.f32.mrf.mxu0 }
 0x209   : > { %v2434_v8 = vpop.f32.mrf.mxu1  ;;  %v2322_v46 = vadd.f32 %v2321_v20, %v2209_v31  ;;  %3695 = vmatprep.mubr.msk.bf16.mxu1 %vm3694_vm4, %v6031_v56  ;;  %v2433_v41 = vadd.f32 %v2432_v11, %v2320_v19  ;;  %vm2499_vm5 = vcmp.ge.f32.partialorder %v2431_v36, 1.0 }
 0x20a   : > { %v2323_v21 = vpop.f32.mrf.mxu0  ;;  %3697 = vmatmul.mubr.msk.bf16.gmra.mxu1 %vm5859_vm1, %v6031_v56 }
 0x20b   : > { %v2436_v5 = vpop.f32.mrf.mxu1  ;;  %v2435_v17 = vadd.f32 %v2434_v8, %v2322_v46  ;;  %v2324_v43 = vadd.f32 %v2323_v21, %v2211_v24  ;;  %vm2500_vm8 = vcmp.ge.f32.partialorder %v2433_v41, 1.0  ;;  %v4354_v8 = vmov 0.0  }
 0x20c   : > { %v2327_v1 = vpop.f32.mrf.mxu0 }
 0x20d   : > { %v2440_v50 = vpop.f32.mrf.mxu1  ;;  %vm2503_vm6 = vcmp.ge.f32.partialorder %v2435_v17, 1.0  ;;  %v2437_v49 = vadd.f32 %v2436_v5, %v2324_v43  ;;  %v2328_v58 = vadd.f32 %v2327_v1, %v5770_v10 }
 0x20e   : > { %vm3700_vm7 = vmpackc.low %vm2503_vm6, %vm2499_vm5  ;;  %v2329_v44 = vpop.f32.mrf.mxu0 }
 0x20f   : > { %v2442_v60 = vpop.f32.mrf.mxu1  ;;  %vm2504_vm9 = vcmp.ge.f32.partialorder %v2437_v49, 1.0  ;;  %v2330_v12 = vadd.f32 %v2329_v44, %v5772_v51  ;;  %v2441_v27 = vadd.f32 %v2440_v50, %v2328_v58 }
 0x210   : > { %vm3698_vm10 = vmpackc.low %vm2504_vm9, %vm2500_vm8  ;;  %v2331_v47 = vpop.f32.mrf.mxu0 }
 0x211   : > { %v2444_v25 = vpop.f32.mrf.mxu1  ;;  %v2332_v3 = vadd.f32 %v2331_v47, %v2219_v42  ;;  %3699 = vmatprep.mubr.msk.bf16.mxu1 %vm3698_vm10, %v6031_v56  ;;  %v2443_v2 = vadd.f32 %v2442_v60, %v2330_v12  ;;  %vm2507_vm11 = vcmp.ge.f32.partialorder %v2441_v27, 1.0 }
 0x212   : > { %v2333_v10 = vpop.f32.mrf.mxu0  ;;  %3701 = vmatmul.mubr.msk.bf16.gmra.mxu1 %vm3700_vm7, %v6031_v56 }
 0x213   : > { %v2445_v9 = vadd.f32 %v2444_v25, %v2332_v3  ;;  %v2334_v61 = vadd.f32 %v2333_v10, %v2221_v45  ;;  %v2446_v16 = vpop.f32.mrf.mxu1  ;;  %vm2508_vm14 = vcmp.ge.f32.partialorder %v2443_v2, 1.0 }
 0x215   : > { %vm2511_vm12 = vcmp.ge.f32.partialorder %v2445_v9, 1.0  ;;  %v2447_v51 = vadd.f32 %v2446_v16, %v2334_v61 }
 0x216   : > { %vm3704_vm13 = vmpackc.low %vm2511_vm12, %vm2507_vm11 }
 0x217   : > { %vm2512_vm15 = vcmp.ge.f32.partialorder %v2447_v51, 1.0 }
 0x218   : > { %vm3702_vm0 = vmpackc.low %vm2512_vm15, %vm2508_vm14 }
 0x219   : > { %3703 = vmatprep.mubr.msk.bf16.mxu1 %vm3702_vm0, %v6031_v56 }
 0x21a   : > { %3705 = vmatmul.mubr.msk.bf16.gmra.mxu1 %vm3704_vm13, %v6031_v56 }
 0x222   : > { %v3807_v52 = vpop.f32.mrf.mxu0 }
 0x224   : > { %v3808_v26 = vpop.f32.mrf.mxu0 }
 0x225   : > { %v3809_v14 = vadd.f32 %v3808_v26, %v3807_v52 }
 0x226   : > { %v3810_v7 = vpop.f32.mrf.mxu0 }
 0x228   : > { %v3811_v62 = vpop.f32.mrf.mxu0 }
 0x229   : > { %v3812_v23 = vadd.f32 %v3811_v62, %v3810_v7 }
 0x22a   : > { %v3813_v48 = vpop.f32.mrf.mxu0 }
 0x22c   : > { %v3814_v59 = vpop.f32.mrf.mxu0 }
 0x22d   : > { %v3815_v31 = vadd.f32 %v3814_v59, %v3813_v48 }
 0x22e   : > { %v3816_v15 = vpop.f32.mrf.mxu0 }
 0x230   : > { %v3817_v33 = vpop.f32.mrf.mxu0 }
 0x231   : > { %v3818_v17 = vadd.f32 %v3817_v33, %v3816_v15 }
 0x232   : > { %v3819_v40 = vpop.f32.mrf.mxu0 }
 0x234   : > { %v3820_v63 = vpop.f32.mrf.mxu0 }
 0x235   : > { %v3821_v44 = vadd.f32 %v3820_v63, %v3819_v40 }
 0x236   : > { %v3822_v29 = vpop.f32.mrf.mxu0 }
 0x238   : > { %v3823_v28 = vpop.f32.mrf.mxu0 }
 0x239   : > { %v3824_v27 = vadd.f32 %v3823_v28, %v3822_v29 }
 0x23a   : > { %v3825_v18 = vpop.f32.mrf.mxu0 }
 0x23c   : > { %v3826_v32 = vpop.f32.mrf.mxu0 }
 0x23d   : > { %v3827_v16 = vadd.f32 %v3826_v32, %v3825_v18 }
 0x23e   : > { %v5882_v39 = vpop.f32.mrf.mxu0 }
 0x240   : > { %v5884_v0 = vpop.f32.mrf.mxu0 }
 0x241   : > { %v3830_v33 = vadd.f32 %v5884_v0, %v5882_v39 }
 0x242   : > { %v5886_v56 = vpop.f32.mrf.mxu0 }
 0x244   : > { %v5888_v55 = vpop.f32.mrf.mxu0 }
 0x245   : > { %v3833_v32 = vadd.f32 %v5888_v55, %v5886_v56 }
 0x246   : > { %v5891_v57 = vpop.f32.mrf.mxu0 }
 0x248   : > { %v5895_v20 = vpop.f32.mrf.mxu0 }
 0x24a   : > { %v3837_v1 = vpop.f32.mrf.mxu0 }
 0x24c   : > { %v3838_v42 = vpop.f32.mrf.mxu0 }
 0x24e   : > { %v3840_v10 = vpop.f32.mrf.mxu0 }
 0x250   : > { %v3841_v52 = vpop.f32.mrf.mxu0 }
 0x252   : > { %v3843_v63 = vpop.f32.mrf.mxu0 }
 0x2a2   : > { %v3871_v34 = vpop.f32.mrf.mxu1 }
 0x2a4   : > { %v3872_v37 = vpop.f32.mrf.mxu1 }
 0x2a5   : > { %v3873_v35 = vadd.f32 %v3872_v37, %v3871_v34  ;;  %v3844_v37 = vpop.f32.mrf.mxu0 }
 0x2a6   : > { %v3874_v4 = vpop.f32.mrf.mxu1 }
 0x2a7   : > { %v3061_v22 = vadd.f32 %v3873_v35, %v3809_v14 }
 0x2a8   : > { %v3875_v13 = vpop.f32.mrf.mxu1 }
 0x2a9   : > { %v3876_v30 = vadd.f32 %v3875_v13, %v3874_v4  ;;  %vm3123_vm1 = vcmp.ge.f32.partialorder %v3061_v22, 1.0  ;;  %v3836_v13 = vadd.f32 %v5895_v20, %v5891_v57  ;;  %v3842_v20 = vadd.f32 %v3841_v52, %v3840_v10 }
 0x2aa   : > { %v3877_v38 = vpop.f32.mrf.mxu1  ;;  %v3706_v24 = vsel %vm3123_vm1, 1.0, %v4354_v8 }
 0x2ab   : > { %v3064_v6 = vadd.f32 %v3876_v30, %v3812_v23  ;;  %v3846_v30 = vpop.f32.mrf.mxu0 }
 0x2ac   : > { %v3878_v11 = vpop.f32.mrf.mxu1 }
 0x2ad   : > { %vm3124_vm2 = vcmp.ge.f32.partialorder %v3064_v6, 1.0  ;;  %v3879_v19 = vadd.f32 %v3878_v11, %v3877_v38  ;;  %v3839_v6 = vadd.f32 %v3838_v42, %v3837_v1 }
 0x2ae   : > { %v3707_v36 = vsel %vm3124_vm2, 1.0, %v4354_v8  ;;  %v3880_v46 = vpop.f32.mrf.mxu1 }
 0x2af   : > { %v3761_v21 = vpack.c.bf16 %v3707_v36, %v3706_v24  ;;  %v3069_v5 = vadd.f32 %v3879_v19, %v3815_v31  ;;  %v3847_v31 = vpop.f32.mrf.mxu0 }
 0x2b0   : > { %v3881_v41 = vpop.f32.mrf.mxu1 }
 0x2b1   : > { %3762 = vst [vmem:[%s5899_s5] sm:$0xff] %v3761_v21   ;;  %v3882_v43 = vadd.f32 %v3881_v41, %v3880_v46  ;;  %vm3125_vm3 = vcmp.ge.f32.partialorder %v3069_v5, 1.0  ;;  %v3849_v41 = vpop.f32.mrf.mxu0 }
 0x2b2   : > { %v3883_v50 = vpop.f32.mrf.mxu1  ;;  %v3708_v12 = vsel %vm3125_vm3, 1.0, %v4354_v8 }
 0x2b3   : > { %v3072_v49 = vadd.f32 %v3882_v43, %v3818_v17 }
 0x2b4   : > { %v3884_v58 = vpop.f32.mrf.mxu1 }
 0x2b5   : > { %vm3126_vm4 = vcmp.ge.f32.partialorder %v3072_v49, 1.0  ;;  %v3885_v60 = vadd.f32 %v3884_v58, %v3883_v50  ;;  %v3845_v50 = vadd.f32 %v3844_v37, %v3843_v63  ;;  %v3850_v58 = vpop.f32.mrf.mxu0 }
 0x2b6   : > { %v3709_v47 = vsel %vm3126_vm4, 1.0, %v4354_v8  ;;  %v3886_v25 = vpop.f32.mrf.mxu1 }
 0x2b7   : > { %v3764_v53 = vpack.c.bf16 %v3709_v47, %v3708_v12  ;;  %v3077_v54 = vadd.f32 %v3885_v60, %v3821_v44 }
 0x2b8   : > { %v3887_v45 = vpop.f32.mrf.mxu1 }
 0x2b9   : > { %3784 = vst [vmem:[%s5899_s5 + $0x8] sm:$0xff] %v3764_v53   ;;  %v3888_v3 = vadd.f32 %v3887_v45, %v3886_v25  ;;  %vm3127_vm5 = vcmp.ge.f32.partialorder %v3077_v54, 1.0  ;;  %v3848_v53 = vadd.f32 %v3847_v31, %v3846_v30  ;;  %v3852_v45 = vpop.f32.mrf.mxu0 }
 0x2ba   : > { %v3889_v2 = vpop.f32.mrf.mxu1  ;;  %v3710_v26 = vsel %vm3127_vm5, 1.0, %v4354_v8 }
 0x2bb   : > { %v3080_v9 = vadd.f32 %v3888_v3, %v3824_v27 }
 0x2bc   : > { %v3890_v61 = vpop.f32.mrf.mxu1 }
 0x2bd   : > { %vm3128_vm6 = vcmp.ge.f32.partialorder %v3080_v9, 1.0  ;;  %v3891_v51 = vadd.f32 %v3890_v61, %v3889_v2  ;;  %v3851_v2 = vadd.f32 %v3850_v58, %v3849_v41  ;;  %v3853_v61 = vpop.f32.mrf.mxu0 }
 0x2be   : > { %v3711_v7 = vsel %vm3128_vm6, 1.0, %v4354_v8  ;;  %v3892_v62 = vpop.f32.mrf.mxu1 }
 0x2bf   : > { %v3767_v48 = vpack.c.bf16 %v3711_v7, %v3710_v26  ;;  %v3085_v59 = vadd.f32 %v3891_v51, %v3827_v16 }
 0x2c0   : > { %v3893_v15 = vpop.f32.mrf.mxu1 }
 0x2c1   : > { %3785 = vst [vmem:[%s5899_s5 + $0x10] sm:$0xff] %v3767_v48   ;;  %v3894_v40 = vadd.f32 %v3893_v15, %v3892_v62  ;;  %vm3129_vm7 = vcmp.ge.f32.partialorder %v3085_v59, 1.0  ;;  %v3854_v48 = vadd.f32 %v3853_v61, %v3852_v45 }
 0x2c2   : > { %v3895_v29 = vpop.f32.mrf.mxu1  ;;  %v3712_v14 = vsel %vm3129_vm7, 1.0, %v4354_v8 }
 0x2c3   : > { %v3088_v28 = vadd.f32 %v3894_v40, %v3830_v33 }
 0x2c4   : > { %v3896_v18 = vpop.f32.mrf.mxu1 }
 0x2c5   : > { %vm3130_vm8 = vcmp.ge.f32.partialorder %v3088_v28, 1.0  ;;  %v3897_v34 = vadd.f32 %v3896_v18, %v3895_v29 }
 0x2c6   : > { %v3713_v35 = vsel %vm3130_vm8, 1.0, %v4354_v8  ;;  %v3898_v4 = vpop.f32.mrf.mxu1 }
 0x2c7   : > { %v3770_v39 = vpack.c.bf16 %v3713_v35, %v3712_v14  ;;  %v3093_v0 = vadd.f32 %v3897_v34, %v3833_v32 }
 0x2c8   : > { %v3899_v22 = vpop.f32.mrf.mxu1 }
 0x2c9   : > { %3786 = vst [vmem:[%s5899_s5 + $0x18] sm:$0xff] %v3770_v39   ;;  %v3900_v23 = vadd.f32 %v3899_v22, %v3898_v4  ;;  %vm3131_vm9 = vcmp.ge.f32.partialorder %v3093_v0, 1.0 }
 0x2ca   : > { %v3901_v38 = vpop.f32.mrf.mxu1  ;;  %v3714_v19 = vsel %vm3131_vm9, 1.0, %v4354_v8 }
 0x2cb   : > { %v3096_v56 = vadd.f32 %v3900_v23, %v3836_v13 }
 0x2cc   : > { %v3902_v55 = vpop.f32.mrf.mxu1 }
 0x2cd   : > { %vm3132_vm10 = vcmp.ge.f32.partialorder %v3096_v56, 1.0  ;;  %v3903_v11 = vadd.f32 %v3902_v55, %v3901_v38 }
 0x2ce   : > { %v3715_v24 = vsel %vm3132_vm10, 1.0, %v4354_v8  ;;  %v3904_v36 = vpop.f32.mrf.mxu1 }
 0x2cf   : > { %v3773_v46 = vpack.c.bf16 %v3715_v24, %v3714_v19  ;;  %v3101_v21 = vadd.f32 %v3903_v11, %v3839_v6 }
 0x2d0   : > { %v3905_v57 = vpop.f32.mrf.mxu1 }
 0x2d1   : > { %3787 = vst [vmem:[%s5899_s5 + $0x20] sm:$0xff] %v3773_v46   ;;  %v3906_v5 = vadd.f32 %v3905_v57, %v3904_v36  ;;  %vm3133_vm11 = vcmp.ge.f32.partialorder %v3101_v21, 1.0 }
 0x2d2   : > { %v3907_v17 = vpop.f32.mrf.mxu1  ;;  %v3716_v44 = vsel %vm3133_vm11, 1.0, %v4354_v8 }
 0x2d3   : > { %v3104_v43 = vadd.f32 %v3906_v5, %v3842_v20 }
 0x2d4   : > { %v3908_v1 = vpop.f32.mrf.mxu1 }
 0x2d5   : > { %vm3134_vm12 = vcmp.ge.f32.partialorder %v3104_v43, 1.0  ;;  %v3909_v49 = vadd.f32 %v3908_v1, %v3907_v17 }
 0x2d6   : > { %v3717_v60 = vsel %vm3134_vm12, 1.0, %v4354_v8  ;;  %v3910_v42 = vpop.f32.mrf.mxu1 }
 0x2d7   : > { %v3776_v12 = vpack.c.bf16 %v3717_v60, %v3716_v44  ;;  %v3109_v47 = vadd.f32 %v3909_v49, %v3845_v50 }
 0x2d8   : > { %v3911_v25 = vpop.f32.mrf.mxu1 }
 0x2d9   : > { %3788 = vst [vmem:[%s5899_s5 + $0x28] sm:$0xff] %v3776_v12   ;;  %v3912_v54 = vadd.f32 %v3911_v25, %v3910_v42  ;;  %vm3135_vm13 = vcmp.ge.f32.partialorder %v3109_v47, 1.0 }
 0x2da   : > { %v3913_v27 = vpop.f32.mrf.mxu1  ;;  %v3718_v16 = vsel %vm3135_vm13, 1.0, %v4354_v8 }
 0x2db   : > { %v3112_v3 = vadd.f32 %v3912_v54, %v3848_v53 }
 0x2dc   : > { %v3914_v10 = vpop.f32.mrf.mxu1 }
 0x2dd   : > { %vm3136_vm14 = vcmp.ge.f32.partialorder %v3112_v3, 1.0  ;;  %v3915_v9 = vadd.f32 %v3914_v10, %v3913_v27 }
 0x2de   : > { %v3719_v51 = vsel %vm3136_vm14, 1.0, %v4354_v8  ;;  %v3916_v52 = vpop.f32.mrf.mxu1 }
 0x2df   : > { %v3779_v26 = vpack.c.bf16 %v3719_v51, %v3718_v16  ;;  %v3117_v7 = vadd.f32 %v3915_v9, %v3851_v2 }
 0x2e0   : > { %v3917_v62 = vpop.f32.mrf.mxu1 }
 0x2e1   : > { %3789 = vst [vmem:[%s5899_s5 + $0x30] sm:$0xff] %v3779_v26   ;;  %v3918_v59 = vadd.f32 %v3917_v62, %v3916_v52  ;;  %vm3137_vm15 = vcmp.ge.f32.partialorder %v3117_v7, 1.0 }
 0x2e2   : > { %v3720_v33 = vsel %vm3137_vm15, 1.0, %v4354_v8 }
 0x2e3   : > { %v3120_v15 = vadd.f32 %v3918_v59, %v3854_v48 }
 0x2e5   : > { %vm3138_vm0 = vcmp.ge.f32.partialorder %v3120_v15, 1.0 }
 0x2e6   : > { %v3721_v40 = vsel %vm3138_vm0, 1.0, %v4354_v8 }
 0x2e7   : > { %v3782_v63 = vpack.c.bf16 %v3721_v40, %v3720_v33 }
 0x2e9   : > { %3790 = vst [vmem:[%s5899_s5 + $0x38] sm:$0xff] %v3782_v63  }
 0x2ea   : > { %4303 = shalt.err (!%p4300_p3)
}
 0x2eb   : > { %s4304_s20 = scalar_lea.hbm %s5933_s10, 1024  ;;  %s4308_s27 = scalar_lea.hbm %s5983_s3, 2048 }
 0x2ec   : > { %p4305_p4 = scmp.ne.s32.totalorder %s5933_s10, %s4304_s20  ;;  %p4309_p9 = scmp.lt.s32.totalorder %s5933_s10, %s5983_s3 }
 0x2ed   : > { %p4310_p10 = scmp.lt.s32.totalorder %s4308_s27, %s4304_s20 }
 0x2ee   : > { %p4306_p7 = pnand %p4305_p4, %p4416_p5 }
 0x2ef   : > { %p4311_p11 = por %p4310_p10, %p4309_p9 }
 0x2f0   : > { %p4307_p8 = pneg %p4306_p7 }
 0x2f2   : > { %p4312_p12 = pnand %p4311_p11, %p4307_p8 }
 0x2f4   : > { %4315 = shalt.err (!%p4312_p12)
}
 0x2f5   : > { %s4356_s26 = smov 64   ;;  %s4357_s4 = smov 4  }
 0x2f6   : > { %3920 = dma.vmem_to_hbm [thread:$0]  (%p4416_p5), %s5935_s7, 1024, %s5933_s10, %s5940_s16, %s4356_s26, %s4356_s26, %s4357_s4  }
 0x2f7 PF: > { %p3926_p13 = scmp.ge.s32.totalorder %s4350_s15, 2  ;;  %s3280_s5 = sand.u32 1, %s4338_s12  }
 0x2f8   : > { %s3281_s6 = scalar_lea.sflag [#allocation3], %s3280_s5 }
 0x2f9   : > { %p3923_p0 = pnand %p3926_p13, %p4420_p6 }
 0x2fb   : > { %p3924_p1 = pneg %p3923_p0 }
 0x2fd   : > { %4333 = dma.done.wait (%p3924_p1), %s3281_s6, 1024  }
 0x2fe   : > { %4335 = vsyncadd (%p3924_p1), %s3281_s6, 4294966272  ;;  %p13_p2 = scmp.ge.s32.totalorder %s4403_s18, 4   ;;  %s6044_s12 = smov %s4342_s13 }
 0x2ff   : > { %s6045_s13 = smov %s4346_s14  ;;  %s6046_s14 = smov %s4414_s21 }
 0x300   : > { %s6047_s15 = smov %s4403_s18  ;;  %15 = sbr.rel (!%p13_p2) target bundleno = 3 (0x3), region = 67 }
 0x305   :  { %3286 = vsyncpa [#allocation3], 1 }
 0x306   :  { %3288 = vsyncpa [#allocation3 + $0x1], 1 }

</bundles_post_ra>
